<compile_context>
chip_gen: v7x
topology: tpu7x:2x2x1
jax: 0.10.0
libtpu: 0.0.40
codegen_flags: <defaults>
</compile_context>

<pallas_src>
import functools

import jax
import jax.numpy as jnp
from jax.experimental import pallas as pl
from jax.experimental.pallas import tpu as pltpu

LANE = 128
_WIDTHS = (1024, 512, 256, 128)        # candidate lane-dense last dims (widest first)
TARGET_BLOCK_BYTES = 4 * 1024 * 1024   # ~4 MiB per block
SMALL_BYTES = 2 * 1024 * 1024          # below this, fused XLA beats a pallas_call launch
VMEM_LIMIT_BYTES = 32 * 1024 * 1024    # 2 bufs x (in+out) x 4 MiB = 16 MiB + headroom; fits v5e..v7x
_SUBLANE_MULT = 16                     # row-tile granularity (covers bf16 sublane packing)


def _round_up(x, m):
    return ((x + m - 1) // m) * m


def _quantize_kernel(x_ref, o_ref, *, step, inv_step):
    # Single fused mul-round-mul, one store per element.  Round in f32,
    # load/store in the native dtype.
    x = x_ref[...].astype(jnp.float32)
    o_ref[...] = (jnp.round(x * inv_step) * step).astype(o_ref.dtype)


def _quantize_ref(x, step, inv_step):
    """Pure-JAX reference / small-tensor & ragged-tail fast path."""
    xf = x.astype(jnp.float32)
    return (jnp.round(xf * inv_step) * step).astype(x.dtype)


# step/inv_step are static (baked per log2_lambda); the input buffer is donated
# so the aliased Pallas output reuses it in place.
# TODO(synk): if log2_lambda is swept at runtime, pass step via an SMEM scalar
# instead of a static arg to avoid recompiles.
@functools.partial(jax.jit, static_argnames=("step", "inv_step"), donate_argnums=(0,))
def _quantize_pallas_2d(x2d, *, step, inv_step):
    rows, width = x2d.shape
    itemsize = x2d.dtype.itemsize
    total_bytes = rows * width * itemsize
    n = rows * width

    # Largest lane-dense block that (a) stays <= ~TARGET_BLOCK_BYTES and
    # (b) leaves >= 2 blocks (>= 4 when the tensor is >= 4 MiB) so the parallel
    # grid axis shards across v7x's 2 TensorCores and pipelining overlaps.
    cap_rows = max(TARGET_BLOCK_BYTES // (width * itemsize), _SUBLANE_MULT)
    n_blocks = 4 if total_bytes >= TARGET_BLOCK_BYTES else 2
    tile_rows = min(cap_rows, _round_up(pl.cdiv(rows, n_blocks), _SUBLANE_MULT))
    tile_rows = max(min(tile_rows, _round_up(rows, _SUBLANE_MULT)), _SUBLANE_MULT)
    grid = (pl.cdiv(rows, tile_rows),)

    kernel = functools.partial(_quantize_kernel, step=step, inv_step=inv_step)

    return pl.pallas_call(
        kernel,
        out_shape=jax.ShapeDtypeStruct((rows, width), x2d.dtype),
        grid=grid,
        in_specs=[pl.BlockSpec((tile_rows, width), lambda i: (i, 0))],
        out_specs=pl.BlockSpec((tile_rows, width), lambda i: (i, 0)),
        input_output_aliases={0: 0},
        cost_estimate=pl.CostEstimate(
            flops=3 * n, transcendentals=0, bytes_accessed=2 * n * itemsize),
        compiler_params=pltpu.CompilerParams(
            # Independent elementwise blocks: shards across v7x's 2 TCs,
            # no-op on single-TC v5e/v6e.
            dimension_semantics=("parallel",),
            vmem_limit_bytes=VMEM_LIMIT_BYTES,
        ),
    )(x2d)


class Quantizer:
    """JAX/Pallas analogue of the PyTorch Quantizer module."""

    def __init__(self, quantized=False, log2_lambda=-18):
        self.quantized = quantized
        self.log2_lambda = log2_lambda

    @property
    def step_size(self):
        # Rate-distortion optimal uniform step for a Laplace prior scales as
        # sqrt(lambda); with lambda = 2**log2_lambda -> step = 2**(log2_lambda/2).
        return float(2.0 ** (self.log2_lambda / 2.0))

    @property
    def bit_depth(self):
        # Not needed for the forward pass; kept for API parity.
        raise NotImplementedError

    def __call__(self, params):
        return self.forward(params)

    def forward(self, params):
        params = jnp.asarray(params)
        if not self.quantized:
            return params

        step = self.step_size
        inv_step = 1.0 / step

        dtype = params.dtype
        n = params.size

        # Small-tensor / unsupported-dtype fast path: let XLA fuse the math.
        # TODO(synk): float dtypes other than f32/bf16 take the pure-JAX path.
        if (n * dtype.itemsize < SMALL_BYTES
                or dtype not in (jnp.dtype(jnp.float32), jnp.dtype(jnp.bfloat16))):
            return _quantize_ref(params, step, inv_step)

        orig_shape = params.shape
        flat = params.reshape(-1)

        tail_len = n % LANE
        n_aligned = n - tail_len

        # Widest lane-dense last dim that divides the aligned element count
        # (wide unmasked stores, fewer per-row DMA descriptors).
        width = next(w for w in _WIDTHS if n_aligned % w == 0)
        prefix = flat if tail_len == 0 else flat[:n_aligned]
        x2d = prefix.reshape(n_aligned // width, width)

        out_flat = _quantize_pallas_2d(x2d, step=step, inv_step=inv_step).reshape(-1)

        if tail_len:
            # Ragged (<128-element) tail handled by the fused-XLA path; avoids
            # the old full-array pad + slice round trip (2 extra HBM passes).
            tail = _quantize_ref(flat[n_aligned:], step, inv_step)
            out_flat = jnp.concatenate([out_flat, tail])

        return out_flat.reshape(orig_shape)


if __name__ == "__main__":
    key = jax.random.PRNGKey(0)
    k1, k2, k3, k4 = jax.random.split(key, 4)

    quantizer = Quantizer(quantized=True, log2_lambda=-18)
    step = quantizer.step_size
    inv_step = 1.0 / step

    # Small conv-weight-like tensor (2,4,16,16) -> small-input fused-XLA path.
    x_small = jax.random.normal(k1, (2, 4, 16, 16), dtype=jnp.float32)
    y_small = jax.block_until_ready(quantizer(x_small))
    ref_small = _quantize_ref(x_small, step, inv_step)
    assert y_small.shape == x_small.shape and y_small.dtype == x_small.dtype
    assert bool(jnp.allclose(y_small, ref_small, atol=1e-6)), "small mismatch"

    # f32 weight-matrix-like tensor (4 MiB) -> Pallas path, 4 parallel blocks.
    x_f32 = jax.random.normal(k2, (1024, 1024), dtype=jnp.float32)
    y_f32 = jax.block_until_ready(quantizer(x_f32))
    ref_f32 = _quantize_ref(x_f32, step, inv_step)
    assert y_f32.shape == x_f32.shape and y_f32.dtype == x_f32.dtype
    assert bool(jnp.allclose(y_f32, ref_f32, atol=1e-6)), "f32 mismatch"

    # bf16 params keep their dtype end-to-end -> Pallas path, 2 blocks.
    x_bf16 = jax.random.normal(k3, (1024, 1024), dtype=jnp.bfloat16)
    y_bf16 = jax.block_until_ready(quantizer(x_bf16))
    ref_bf16 = _quantize_ref(x_bf16, step, inv_step)
    assert y_bf16.shape == x_bf16.shape and y_bf16.dtype == jnp.bfloat16
    assert bool(jnp.array_equal(y_bf16, ref_bf16)), "bf16 mismatch"

    # Unaligned flat tensor (prefix -> Pallas, 37-element tail -> XLA path).
    x_ragged = jax.random.normal(k4, (524288 + 37,), dtype=jnp.float32)
    y_ragged = jax.block_until_ready(quantizer(x_ragged))
    ref_ragged = _quantize_ref(x_ragged, step, inv_step)
    assert y_ragged.shape == x_ragged.shape and y_ragged.dtype == x_ragged.dtype
    assert bool(jnp.allclose(y_ragged, ref_ragged, atol=1e-6)), "ragged mismatch"

    # Passthrough path (quantized=False) returns the input unchanged.
    passthrough = Quantizer(quantized=False)(x_small)
    assert bool(jnp.allclose(passthrough, x_small)), "passthrough mismatch"

    print("KERNEL_OK")
</pallas_src>

<mosaic_0001>
module attributes {stable_mosaic.version = 11 : i64} {
  func.func @_quantize_kernel(%arg0: i32, %arg1: memref<256x1024xf32, #tpu.memory_space<vmem>>, %arg2: memref<256x1024xf32, #tpu.memory_space<vmem>>) attributes {dimension_semantics = [#tpu.dimension_semantics<parallel>], iteration_bounds = array<i64: 4>, scalar_prefetch = 0 : i64, scratch_operands = 0 : i64, tpu.core_type = #tpu.core_type<tc>, window_params = [{transform_indices = @transform_0, window_bounds = array<i64: 256, 1024>}, {transform_indices = @transform_1, window_bounds = array<i64: 256, 1024>}]} {
    %c0 = arith.constant 0 : index
    %c0_0 = arith.constant 0 : index
    %0 = vector.load %arg1[%c0, %c0_0] : memref<256x1024xf32, #tpu.memory_space<vmem>>, vector<256x1024xf32>
    %cst = arith.constant 5.120000e+02 : f32
    %1 = vector.broadcast %cst : f32 to vector<256x1024xf32>
    %2 = arith.mulf %0, %1 : vector<256x1024xf32>
    %3 = math.roundeven %2 : vector<256x1024xf32>
    %cst_1 = arith.constant 0.001953125 : f32
    %4 = vector.broadcast %cst_1 : f32 to vector<256x1024xf32>
    %5 = arith.mulf %3, %4 : vector<256x1024xf32>
    %c0_2 = arith.constant 0 : index
    %c0_3 = arith.constant 0 : index
    %6 = vector.load %arg2[%c0_2, %c0_3] : memref<256x1024xf32, #tpu.memory_space<vmem>>, vector<256x1024xf32>
    tpu.vector_store %arg2[%c0_2, %c0_3], %5 {strides = array<i32>} : memref<256x1024xf32, #tpu.memory_space<vmem>>, vector<256x1024xf32>,
    return
  }
  func.func @transform_0(%arg0: i32) -> (i32, i32) {
    %c0_i32 = arith.constant 0 : i32
    %c0_i32_0 = arith.constant 0 : i32
    return %arg0, %c0_i32 : i32, i32
  }
  func.func @transform_1(%arg0: i32) -> (i32, i32) {
    %c0_i32 = arith.constant 0 : i32
    %c0_i32_0 = arith.constant 0 : i32
    return %arg0, %c0_i32 : i32, i32
  }
}

</mosaic_0001>

<bundles_post_ra>
// kernel: _quantize_pallas_2d.1
= control target key start
LH: loop header
LB: loop body
LE: loop exit
PB: predicated region body
PF: predicated region fallthrough
CT: control target
= control target key end

     0   :  { %6 = vsyncpa [#allocation3], 0  ;;  %s2627_s0 = inlined_call_operand.hbm [shape: f32[1024,1024], index: 0, kind: input, shape index: {}, may-alias: {0,1}]   ;;  %s2628_s1 = inlined_call_operand.hbm [shape: f32[1024,1024], index: 1, kind: output, shape index: {}, may-alias: {0,1}]  }
   0x1   :  { %8 = vsyncpa [#allocation3 + $0x1], 0 }
   0x2   :  { %9 = vsyncpa [#allocation4], 0 }
   0x3   :  { %11 = vsyncpa [#allocation4 + $0x1], 0  ;;  %s1946_s6 = smov 0   ;;  %s1948_s7 = smov 0  }
   0x4   :  { %s1950_s8 = smov 0   ;;  %s1952_s9 = smov 0  }
   0x5 LB: > { %s1967_s10 = sadd.s32 4294967295, %s1928_s9   ;;  %s1506_s11 = sadd.s32 4294967294, %s1928_s9   ;;  %s1928_s9 = sphi %s1952_s9, %s2640_s9   ;;  %s1924_s8 = sphi %s1950_s8, %s2639_s8   ;;  %s1920_s7 = sphi %s1948_s7, %s2638_s7   ;;  %s1916_s6 = sphi %s1946_s6, %s2637_s6  }
   0x6   : > { %s1971_s12 = sadd.s32 1, %s1928_s9   ;;  %s24_s13 = sadd.s32 1, %s1924_s8 }
   0x7   : > { %s21_s14 = ssub.s32 %s1928_s9, %s1971_s12  ;;  %p31_p0 = scmp.ne.s32.totalorder %s1924_s8, %s1920_s7 }
   0x8   : > { %p22_p1 = scmp.eq.s32.totalorder %s21_s14, 0  ;;  %p32_p2 = scmp.eq.s32.totalorder %s1928_s9, 0 }
   0x9   : > { %p37_p3 = scmp.ne.s32.totalorder %s1920_s7, %s1916_s6  ;;  %p38_p4 = scmp.eq.s32.totalorder %s1967_s10, 0 }
   0xa   : > { %s1983_s15 = scalar_select %p22_p1, %s1924_s8, %s24_s13  }
   0xb   : > { %p1985_p5 = por %p32_p2, %p31_p0  ;;  %p1989_p6 = por %p38_p4, %p37_p3 }
   0xc   : > { %p61_p7 = scmp.eq.s32.totalorder %s1967_s10, 3  ;;  %p67_p8 = scmp.eq.s32.totalorder %s1506_s11, 3 }
   0xd   : > { %p1794_p9 = scmp.lt.s32.totalorder %s1928_s9, 4  ;;  %s87_s20 = sand.u32 1, %s1924_s8  }
   0xe   : > { %p1995_p10 = por %p61_p7, %p31_p0  ;;  %p1999_p11 = por %p67_p8, %p37_p3 }
   0xf   : > { %s1523_s21 = sshll.u32 %s1928_s9, 15  ;;  %s1509_s22 = sshll.u32 %s87_s20, 11 }
  0x10   : > { %s2632_s18 = scalar_select %p1995_p10, 1, 0 }
  0x11   : > { %s2633_s19 = scalar_select %p1999_p11, 1, 0 }
  0x12   : > { %s2008_s25 = scalar_lea.hbm %s2627_s0, %s1523_s21  ;;  %s91_s26 = scalar_lea.vmem [#allocation2], %s1509_s22 }
  0x13   : > { %s99_s27 = sshll.u32 %s91_s26, 4  ;;  %p2012_p12 = pnand %p1794_p9, %p1985_p5  ;;  %s2016_s27 = int_to_ptr.vmem [resolvable:$true] %s99_s27 }
  0x14   : > { %s2018_s29 = scalar_lea.sflag [#allocation3], %s87_s20  ;;  %s1832_s30 = scalar_lea.hbm %s2008_s25, 32768 }
  0x15   : > { %p1833_p13 = scmp.ne.s32.totalorder %s2008_s25, %s1832_s30  ;;  %p1834_p0 = pneg %p2012_p12 }
  0x16   : > { %s1837_s4 = scalar_lea.hbm %s2627_s0, 131072  ;;  %p1838_p3 = scmp.lt.u32.totalorder %s2008_s25, %s2627_s0 }
  0x17   : > { %p1835_p1 = pnand %p1834_p0, %p1833_p13  ;;  %p1839_p4 = scmp.lt.u32.totalorder %s1837_s4, %s1832_s30 }
  0x18   : > { %p1841_p7 = scmp.lt.u32.totalorder %s1832_s30, %s2008_s25 }
  0x19   : > { %p1836_p2 = pneg %p1835_p1  ;;  %p1840_p5 = por %p1839_p4, %p1838_p3 }
  0x1b   : > { %p1842_p8 = por %p1841_p7, %p1840_p5 }
  0x1d   : > { %p1843_p9 = pnand %p1842_p8, %p1836_p2 }
  0x1f   : > { %1846 = shalt.err (!%p1843_p9)
}
  0x20   : > { %s1847_s13 = scalar_lea.vmem %s2016_s27, 32768  ;;  %s1930_s14 = smov [#allocation2]  }
  0x21   : > { %p1848_p13 = scmp.ne.s32.totalorder %s2016_s27, %s1847_s13  ;;  %s1852_s16 = sshll.u32 %s1930_s14, 4  ;;  %s1853_s16 = int_to_ptr.vmem [resolvable:$false] %s1852_s16 }
  0x22   : > { %s1854_s20 = scalar_lea.vmem %s1853_s16, 65536  ;;  %p1855_p10 = scmp.lt.s32.totalorder %s2016_s27, %s1853_s16 }
  0x23   : > { %p1850_p1 = pnand %p1848_p13, %p1834_p0  ;;  %p1856_p3 = scmp.lt.s32.totalorder %s1854_s20, %s1847_s13 }
  0x25   : > { %p1851_p11 = pneg %p1850_p1  ;;  %p1857_p4 = por %p1856_p3, %p1855_p10 }
  0x27   : > { %p1858_p5 = pnand %p1857_p4, %p1851_p11 }
  0x29   : > { %1861 = shalt.err (!%p1858_p5)
}
  0x2a   : > { %s1931_s21 = smov 1024   ;;  %s1932_s22 = smov 64  }
  0x2b   : > { %1789 = dma.hbm_to_vmem [thread:$0]  (!%p2012_p12), %s2008_s25, 32768, %s2016_s27, %s2018_s29, %s1931_s21, %s1931_s21, %s1932_s22  }
  0x2c   : > { %p1513_p0 = scmp.ge.s32.totalorder %s1928_s9, 1  ;;  %p107_p2 = scmp.lt.s32.totalorder %s1928_s9, 5 }
  0x2e   : > { %p108_p7 = pnand %p1513_p0, %p107_p2 }
  0x2f   : > { %s2049_s23 = sand.u32 (!%p108_p7), 1, %s1920_s7  }
  0x30   : > { %111 = sbr.rel (%p108_p7) target bundleno = 267 (0x10b), region = 24  ;;  %s1514_s24 = sshll.u32 (!%p108_p7), %s2049_s23, 11 }
  0x31   : > { %s114_s26 = scalar_lea.sflag (!%p108_p7), [#allocation3], %s2049_s23  ;;  %s2055_s30 = scalar_lea.vmem (!%p108_p7), [#allocation2], %s1514_s24 }
  0x37   : > { %1907 = dma.done.wait (%p1989_p6), %s114_s26, 32768  }
  0x38   : > { %1909 = vsyncadd (%p1989_p6), %s114_s26, 4294934528  ;;  %v138_v0 = vld [vmem:[%s2055_s30] sm:$0xff]  ;;  %v139_v1 = vld [vmem:[%s2055_s30 + $0x8] sm:$0xff]  ;;  %s2078_s17 = scalar_lea.vmem [#allocation5], %s1514_s24  ;;  %s1525_s25 = sshll.u32 %s1967_s10, 15 }
  0x39   : > { %v140_v2 = vld [vmem:[%s2055_s30 + $0x10] sm:$0xff]  ;;  %v394_v3 = vmul.f32 512.0, %v138_v0  ;;  %v395_v4 = vmul.f32 512.0, %v139_v1  ;;  %v141_v6 = vld [vmem:[%s2055_s30 + $0x18] sm:$0xff]  ;;  %v142_v7 = vld [vmem:[%s2055_s30 + $0x20] sm:$0xff]  ;;  %s1433_s27 = sshll.u32 %s2078_s17, 4  ;;  %s2577_s29 = scalar_lea.hbm %s2628_s1, %s1525_s25  ;;  %s2579_s27 = int_to_ptr.vmem [resolvable:$true] %s1433_s27 }
  0x3a   : > { %v396_v5 = vmul.f32 512.0, %v140_v2  ;;  %v143_v8 = vld [vmem:[%s2055_s30 + $0x28] sm:$0xff]  ;;  %v397_v9 = vmul.f32 512.0, %v141_v6  ;;  %v398_v10 = vmul.f32 512.0, %v142_v7  ;;  %v144_v12 = vld [vmem:[%s2055_s30 + $0x30] sm:$0xff]  ;;  %v145_v13 = vld [vmem:[%s2055_s30 + $0x38] sm:$0xff] }
  0x3b   : > { %v399_v11 = vmul.f32 512.0, %v143_v8  ;;  %v1526_v14 = vround.rtne.f32 %v394_v3  ;;  %v1527_v15 = vround.rtne.f32 %v395_v4  ;;  %v400_v17 = vmul.f32 512.0, %v144_v12  ;;  %v146_v22 = vld [vmem:[%s2055_s30 + $0x40] sm:$0xff]  ;;  %v147_v23 = vld [vmem:[%s2055_s30 + $0x48] sm:$0xff]  ;;  %v148_v24 = vld [vmem:[%s2055_s30 + $0x50] sm:$0xff]  ;;  %s1419_s2 = scalar_lea.sflag [#allocation4], %s2049_s23 }
  0x3c   : > { %v1528_v16 = vround.rtne.f32 %v396_v5  ;;  %v1529_v18 = vround.rtne.f32 %v397_v9  ;;  %v1530_v19 = vround.rtne.f32 %v398_v10  ;;  %v401_v21 = vmul.f32 512.0, %v145_v13  ;;  %v149_v29 = vld [vmem:[%s2055_s30 + $0x58] sm:$0xff]  ;;  %v150_v30 = vld [vmem:[%s2055_s30 + $0x60] sm:$0xff]  ;;  %v151_v31 = vld [vmem:[%s2055_s30 + $0x68] sm:$0xff]  ;;  %s1862_s3 = scalar_lea.vmem %s2579_s27, 32768  ;;  %p2635_p10 = scmp.ne.s32.totalorder %s2632_s18, 0 }
  0x3d   : > { %v1531_v20 = vround.rtne.f32 %v399_v11  ;;  %v906_v25 = vmul.f32 0.001953125, %v1526_v14  ;;  %v907_v26 = vmul.f32 0.001953125, %v1527_v15  ;;  %v1532_v28 = vround.rtne.f32 %v400_v17  ;;  %v152_v36 = vld [vmem:[%s2055_s30 + $0x70] sm:$0xff]  ;;  %v153_v41 = vld [vmem:[%s2055_s30 + $0x78] sm:$0xff]  ;;  %v154_v54 = vld [vmem:[%s2055_s30 + $0x80] sm:$0xff]  ;;  %p1863_p6 = scmp.ne.s32.totalorder %s2579_s27, %s1862_s3  ;;  %s1933_s4 = smov [#allocation5]  }
  0x3e   : > { %v908_v27 = vmul.f32 0.001953125, %v1528_v16  ;;  %v909_v32 = vmul.f32 0.001953125, %v1529_v18  ;;  %v910_v33 = vmul.f32 0.001953125, %v1530_v19  ;;  %v1533_v35 = vround.rtne.f32 %v401_v21  ;;  %v155_v55 = vld [vmem:[%s2055_s30 + $0x88] sm:$0xff]  ;;  %v156_v56 = vld [vmem:[%s2055_s30 + $0x90] sm:$0xff]  ;;  %v157_v61 = vld [vmem:[%s2055_s30 + $0x98] sm:$0xff] }
  0x3f   : > { %v911_v34 = vmul.f32 0.001953125, %v1531_v20  ;;  %1162 = vst [vmem:[%s2078_s17] sm:$0xff] %v906_v25  ;;  %1163 = vst [vmem:[%s2078_s17 + $0x8] sm:$0xff] %v907_v26  ;;  %v912_v37 = vmul.f32 0.001953125, %v1532_v28  ;;  %v402_v38 = vmul.f32 512.0, %v146_v22  ;;  %v403_v39 = vmul.f32 512.0, %v147_v23  ;;  %v158_v62 = vld [vmem:[%s2055_s30 + $0xa0] sm:$0xff]  ;;  %p1864_p11 = pnand %p1863_p6, %p2635_p10 }
  0x40   : > { %1164 = vst [vmem:[%s2078_s17 + $0x10] sm:$0xff] %v908_v27  ;;  %v404_v40 = vmul.f32 512.0, %v148_v24  ;;  %1165 = vst [vmem:[%s2078_s17 + $0x18] sm:$0xff] %v909_v32  ;;  %v913_v42 = vmul.f32 0.001953125, %v1533_v35  ;;  %v405_v43 = vmul.f32 512.0, %v149_v29  ;;  %v406_v44 = vmul.f32 512.0, %v150_v30 }
  0x41   : > { %1166 = vst [vmem:[%s2078_s17 + $0x20] sm:$0xff] %v910_v33  ;;  %1167 = vst [vmem:[%s2078_s17 + $0x28] sm:$0xff] %v911_v34  ;;  %v407_v45 = vmul.f32 512.0, %v151_v31  ;;  %v1534_v46 = vround.rtne.f32 %v402_v38  ;;  %v1535_v47 = vround.rtne.f32 %v403_v39  ;;  %v408_v49 = vmul.f32 512.0, %v152_v36  ;;  %v159_v63 = vld [vmem:[%s2055_s30 + $0xa8] sm:$0xff]  ;;  %v160_v4 = vld [vmem:[%s2055_s30 + $0xb0] sm:$0xff]  ;;  %p1865_p12 = pneg %p1864_p11 }
  0x42   : > { %1168 = vst [vmem:[%s2078_s17 + $0x30] sm:$0xff] %v912_v37  ;;  %v1536_v48 = vround.rtne.f32 %v404_v40  ;;  %1169 = vst [vmem:[%s2078_s17 + $0x38] sm:$0xff] %v913_v42  ;;  %v1537_v50 = vround.rtne.f32 %v405_v43  ;;  %v1538_v51 = vround.rtne.f32 %v406_v44  ;;  %v409_v53 = vmul.f32 512.0, %v153_v41  ;;  %v161_v9 = vld [vmem:[%s2055_s30 + $0xb8] sm:$0xff]  ;;  %v162_v22 = vld [vmem:[%s2055_s30 + $0xc0] sm:$0xff]  ;;  %s1866_s5 = sshll.u32 %s1933_s4, 4  ;;  %s1867_s5 = int_to_ptr.vmem [resolvable:$false] %s1866_s5 }
  0x43   : > { %v1539_v52 = vround.rtne.f32 %v407_v45  ;;  %v914_v57 = vmul.f32 0.001953125, %v1534_v46  ;;  %v915_v58 = vmul.f32 0.001953125, %v1535_v47  ;;  %v1540_v60 = vround.rtne.f32 %v408_v49  ;;  %v163_v23 = vld [vmem:[%s2055_s30 + $0xc8] sm:$0xff]  ;;  %v164_v24 = vld [vmem:[%s2055_s30 + $0xd0] sm:$0xff]  ;;  %v165_v29 = vld [vmem:[%s2055_s30 + $0xd8] sm:$0xff]  ;;  %s1868_s11 = scalar_lea.vmem %s1867_s5, 65536  ;;  %p1869_p8 = scmp.lt.s32.totalorder %s2579_s27, %s1867_s5 }
  0x44   : > { %v916_v59 = vmul.f32 0.001953125, %v1536_v48  ;;  %v917_v0 = vmul.f32 0.001953125, %v1537_v50  ;;  %v918_v1 = vmul.f32 0.001953125, %v1538_v51  ;;  %v1541_v3 = vround.rtne.f32 %v409_v53  ;;  %v166_v30 = vld [vmem:[%s2055_s30 + $0xe0] sm:$0xff]  ;;  %v167_v31 = vld [vmem:[%s2055_s30 + $0xe8] sm:$0xff]  ;;  %v168_v36 = vld [vmem:[%s2055_s30 + $0xf0] sm:$0xff]  ;;  %p1870_p9 = scmp.lt.s32.totalorder %s1868_s11, %s1862_s3 }
  0x45   : > { %v919_v2 = vmul.f32 0.001953125, %v1539_v52  ;;  %1170 = vst [vmem:[%s2078_s17 + $0x40] sm:$0xff] %v914_v57  ;;  %1171 = vst [vmem:[%s2078_s17 + $0x48] sm:$0xff] %v915_v58  ;;  %v920_v5 = vmul.f32 0.001953125, %v1540_v60  ;;  %v410_v6 = vmul.f32 512.0, %v154_v54  ;;  %v411_v7 = vmul.f32 512.0, %v155_v55 }
  0x46   : > { %1172 = vst [vmem:[%s2078_s17 + $0x50] sm:$0xff] %v916_v59  ;;  %v412_v8 = vmul.f32 512.0, %v156_v56  ;;  %1173 = vst [vmem:[%s2078_s17 + $0x58] sm:$0xff] %v917_v0  ;;  %v921_v10 = vmul.f32 0.001953125, %v1541_v3  ;;  %v413_v11 = vmul.f32 512.0, %v157_v61  ;;  %v414_v12 = vmul.f32 512.0, %v158_v62  ;;  %p1871_p13 = por %p1870_p9, %p1869_p8 }
  0x47   : > { %1174 = vst [vmem:[%s2078_s17 + $0x60] sm:$0xff] %v918_v1  ;;  %1175 = vst [vmem:[%s2078_s17 + $0x68] sm:$0xff] %v919_v2  ;;  %v415_v13 = vmul.f32 512.0, %v159_v63  ;;  %v1542_v14 = vround.rtne.f32 %v410_v6  ;;  %v1543_v15 = vround.rtne.f32 %v411_v7  ;;  %v416_v17 = vmul.f32 512.0, %v160_v4  ;;  %v169_v41 = vld [vmem:[%s2055_s30 + $0xf8] sm:$0xff]  ;;  %v170_v54 = vld [vmem:[%s2055_s30 + $0x100] sm:$0xff] }
  0x48   : > { %1176 = vst [vmem:[%s2078_s17 + $0x70] sm:$0xff] %v920_v5  ;;  %v1544_v16 = vround.rtne.f32 %v412_v8  ;;  %1177 = vst [vmem:[%s2078_s17 + $0x78] sm:$0xff] %v921_v10  ;;  %v1545_v18 = vround.rtne.f32 %v413_v11  ;;  %v1546_v19 = vround.rtne.f32 %v414_v12  ;;  %v417_v21 = vmul.f32 512.0, %v161_v9  ;;  %v171_v55 = vld [vmem:[%s2055_s30 + $0x108] sm:$0xff]  ;;  %v172_v56 = vld [vmem:[%s2055_s30 + $0x110] sm:$0xff]  ;;  %p1872_p1 = pnand %p1871_p13, %p1865_p12 }
  0x49   : > { %v1547_v20 = vround.rtne.f32 %v415_v13  ;;  %v922_v25 = vmul.f32 0.001953125, %v1542_v14  ;;  %v923_v26 = vmul.f32 0.001953125, %v1543_v15  ;;  %v1548_v28 = vround.rtne.f32 %v416_v17  ;;  %v173_v61 = vld [vmem:[%s2055_s30 + $0x118] sm:$0xff]  ;;  %v174_v62 = vld [vmem:[%s2055_s30 + $0x120] sm:$0xff]  ;;  %v175_v63 = vld [vmem:[%s2055_s30 + $0x128] sm:$0xff] }
  0x4a   : > { %v924_v27 = vmul.f32 0.001953125, %v1544_v16  ;;  %v925_v32 = vmul.f32 0.001953125, %v1545_v18  ;;  %v926_v33 = vmul.f32 0.001953125, %v1546_v19  ;;  %v1549_v35 = vround.rtne.f32 %v417_v21  ;;  %v176_v4 = vld [vmem:[%s2055_s30 + $0x130] sm:$0xff]  ;;  %v177_v9 = vld [vmem:[%s2055_s30 + $0x138] sm:$0xff] }
  0x4b   : > { %v927_v34 = vmul.f32 0.001953125, %v1547_v20  ;;  %1178 = vst [vmem:[%s2078_s17 + $0x80] sm:$0xff] %v922_v25  ;;  %1179 = vst [vmem:[%s2078_s17 + $0x88] sm:$0xff] %v923_v26  ;;  %v928_v37 = vmul.f32 0.001953125, %v1548_v28  ;;  %v418_v38 = vmul.f32 512.0, %v162_v22  ;;  %v419_v39 = vmul.f32 512.0, %v163_v23 }
  0x4c   : > { %1180 = vst [vmem:[%s2078_s17 + $0x90] sm:$0xff] %v924_v27  ;;  %v420_v40 = vmul.f32 512.0, %v164_v24  ;;  %1181 = vst [vmem:[%s2078_s17 + $0x98] sm:$0xff] %v925_v32  ;;  %v929_v42 = vmul.f32 0.001953125, %v1549_v35  ;;  %v421_v43 = vmul.f32 512.0, %v165_v29  ;;  %v422_v44 = vmul.f32 512.0, %v166_v30 }
  0x4d   : > { %1182 = vst [vmem:[%s2078_s17 + $0xa0] sm:$0xff] %v926_v33  ;;  %1183 = vst [vmem:[%s2078_s17 + $0xa8] sm:$0xff] %v927_v34  ;;  %v423_v45 = vmul.f32 512.0, %v167_v31  ;;  %v1550_v46 = vround.rtne.f32 %v418_v38  ;;  %v1551_v47 = vround.rtne.f32 %v419_v39  ;;  %v424_v49 = vmul.f32 512.0, %v168_v36  ;;  %v178_v22 = vld [vmem:[%s2055_s30 + $0x140] sm:$0xff]  ;;  %v179_v23 = vld [vmem:[%s2055_s30 + $0x148] sm:$0xff] }
  0x4e   : > { %1184 = vst [vmem:[%s2078_s17 + $0xb0] sm:$0xff] %v928_v37  ;;  %v1552_v48 = vround.rtne.f32 %v420_v40  ;;  %1185 = vst [vmem:[%s2078_s17 + $0xb8] sm:$0xff] %v929_v42  ;;  %v1553_v50 = vround.rtne.f32 %v421_v43  ;;  %v1554_v51 = vround.rtne.f32 %v422_v44  ;;  %v425_v53 = vmul.f32 512.0, %v169_v41  ;;  %v180_v24 = vld [vmem:[%s2055_s30 + $0x150] sm:$0xff]  ;;  %v181_v29 = vld [vmem:[%s2055_s30 + $0x158] sm:$0xff] }
  0x4f   : > { %v1555_v52 = vround.rtne.f32 %v423_v45  ;;  %v930_v57 = vmul.f32 0.001953125, %v1550_v46  ;;  %v931_v58 = vmul.f32 0.001953125, %v1551_v47  ;;  %v1556_v60 = vround.rtne.f32 %v424_v49  ;;  %v182_v30 = vld [vmem:[%s2055_s30 + $0x160] sm:$0xff]  ;;  %v183_v31 = vld [vmem:[%s2055_s30 + $0x168] sm:$0xff]  ;;  %v184_v36 = vld [vmem:[%s2055_s30 + $0x170] sm:$0xff] }
  0x50   : > { %v932_v59 = vmul.f32 0.001953125, %v1552_v48  ;;  %v933_v0 = vmul.f32 0.001953125, %v1553_v50  ;;  %v934_v1 = vmul.f32 0.001953125, %v1554_v51  ;;  %v1557_v3 = vround.rtne.f32 %v425_v53  ;;  %v185_v41 = vld [vmem:[%s2055_s30 + $0x178] sm:$0xff] }
  0x51   : > { %v935_v2 = vmul.f32 0.001953125, %v1555_v52  ;;  %1186 = vst [vmem:[%s2078_s17 + $0xc0] sm:$0xff] %v930_v57  ;;  %1187 = vst [vmem:[%s2078_s17 + $0xc8] sm:$0xff] %v931_v58  ;;  %v936_v5 = vmul.f32 0.001953125, %v1556_v60  ;;  %v426_v6 = vmul.f32 512.0, %v170_v54  ;;  %v427_v7 = vmul.f32 512.0, %v171_v55 }
  0x52   : > { %1188 = vst [vmem:[%s2078_s17 + $0xd0] sm:$0xff] %v932_v59  ;;  %v428_v8 = vmul.f32 512.0, %v172_v56  ;;  %1189 = vst [vmem:[%s2078_s17 + $0xd8] sm:$0xff] %v933_v0  ;;  %v937_v10 = vmul.f32 0.001953125, %v1557_v3  ;;  %v429_v11 = vmul.f32 512.0, %v173_v61  ;;  %v430_v12 = vmul.f32 512.0, %v174_v62 }
  0x53   : > { %1190 = vst [vmem:[%s2078_s17 + $0xe0] sm:$0xff] %v934_v1  ;;  %1191 = vst [vmem:[%s2078_s17 + $0xe8] sm:$0xff] %v935_v2  ;;  %v431_v13 = vmul.f32 512.0, %v175_v63  ;;  %v1558_v14 = vround.rtne.f32 %v426_v6  ;;  %v1559_v15 = vround.rtne.f32 %v427_v7  ;;  %v432_v17 = vmul.f32 512.0, %v176_v4  ;;  %v186_v54 = vld [vmem:[%s2055_s30 + $0x180] sm:$0xff]  ;;  %v187_v55 = vld [vmem:[%s2055_s30 + $0x188] sm:$0xff] }
  0x54   : > { %1192 = vst [vmem:[%s2078_s17 + $0xf0] sm:$0xff] %v936_v5  ;;  %v1560_v16 = vround.rtne.f32 %v428_v8  ;;  %1193 = vst [vmem:[%s2078_s17 + $0xf8] sm:$0xff] %v937_v10  ;;  %v1561_v18 = vround.rtne.f32 %v429_v11  ;;  %v1562_v19 = vround.rtne.f32 %v430_v12  ;;  %v433_v21 = vmul.f32 512.0, %v177_v9  ;;  %v188_v56 = vld [vmem:[%s2055_s30 + $0x190] sm:$0xff]  ;;  %v189_v61 = vld [vmem:[%s2055_s30 + $0x198] sm:$0xff] }
  0x55   : > { %v1563_v20 = vround.rtne.f32 %v431_v13  ;;  %v938_v25 = vmul.f32 0.001953125, %v1558_v14  ;;  %v939_v26 = vmul.f32 0.001953125, %v1559_v15  ;;  %v1564_v28 = vround.rtne.f32 %v432_v17  ;;  %v190_v62 = vld [vmem:[%s2055_s30 + $0x1a0] sm:$0xff]  ;;  %v191_v63 = vld [vmem:[%s2055_s30 + $0x1a8] sm:$0xff]  ;;  %v192_v4 = vld [vmem:[%s2055_s30 + $0x1b0] sm:$0xff] }
  0x56   : > { %v940_v27 = vmul.f32 0.001953125, %v1560_v16  ;;  %v941_v32 = vmul.f32 0.001953125, %v1561_v18  ;;  %v942_v33 = vmul.f32 0.001953125, %v1562_v19  ;;  %v1565_v35 = vround.rtne.f32 %v433_v21  ;;  %v193_v9 = vld [vmem:[%s2055_s30 + $0x1b8] sm:$0xff] }
  0x57   : > { %v943_v34 = vmul.f32 0.001953125, %v1563_v20  ;;  %1194 = vst [vmem:[%s2078_s17 + $0x100] sm:$0xff] %v938_v25  ;;  %1195 = vst [vmem:[%s2078_s17 + $0x108] sm:$0xff] %v939_v26  ;;  %v944_v37 = vmul.f32 0.001953125, %v1564_v28  ;;  %v434_v38 = vmul.f32 512.0, %v178_v22  ;;  %v435_v39 = vmul.f32 512.0, %v179_v23 }
  0x58   : > { %1196 = vst [vmem:[%s2078_s17 + $0x110] sm:$0xff] %v940_v27  ;;  %v436_v40 = vmul.f32 512.0, %v180_v24  ;;  %1197 = vst [vmem:[%s2078_s17 + $0x118] sm:$0xff] %v941_v32  ;;  %v945_v42 = vmul.f32 0.001953125, %v1565_v35  ;;  %v437_v43 = vmul.f32 512.0, %v181_v29  ;;  %v438_v44 = vmul.f32 512.0, %v182_v30 }
  0x59   : > { %1198 = vst [vmem:[%s2078_s17 + $0x120] sm:$0xff] %v942_v33  ;;  %1199 = vst [vmem:[%s2078_s17 + $0x128] sm:$0xff] %v943_v34  ;;  %v439_v45 = vmul.f32 512.0, %v183_v31  ;;  %v1566_v46 = vround.rtne.f32 %v434_v38  ;;  %v1567_v47 = vround.rtne.f32 %v435_v39  ;;  %v440_v49 = vmul.f32 512.0, %v184_v36  ;;  %v194_v22 = vld [vmem:[%s2055_s30 + $0x1c0] sm:$0xff]  ;;  %v195_v23 = vld [vmem:[%s2055_s30 + $0x1c8] sm:$0xff] }
  0x5a   : > { %1200 = vst [vmem:[%s2078_s17 + $0x130] sm:$0xff] %v944_v37  ;;  %v1568_v48 = vround.rtne.f32 %v436_v40  ;;  %1201 = vst [vmem:[%s2078_s17 + $0x138] sm:$0xff] %v945_v42  ;;  %v1569_v50 = vround.rtne.f32 %v437_v43  ;;  %v1570_v51 = vround.rtne.f32 %v438_v44  ;;  %v441_v53 = vmul.f32 512.0, %v185_v41  ;;  %v196_v24 = vld [vmem:[%s2055_s30 + $0x1d0] sm:$0xff]  ;;  %v197_v29 = vld [vmem:[%s2055_s30 + $0x1d8] sm:$0xff] }
  0x5b   : > { %v1571_v52 = vround.rtne.f32 %v439_v45  ;;  %v946_v57 = vmul.f32 0.001953125, %v1566_v46  ;;  %v947_v58 = vmul.f32 0.001953125, %v1567_v47  ;;  %v1572_v60 = vround.rtne.f32 %v440_v49  ;;  %v198_v30 = vld [vmem:[%s2055_s30 + $0x1e0] sm:$0xff]  ;;  %v199_v31 = vld [vmem:[%s2055_s30 + $0x1e8] sm:$0xff]  ;;  %v200_v36 = vld [vmem:[%s2055_s30 + $0x1f0] sm:$0xff] }
  0x5c   : > { %v948_v59 = vmul.f32 0.001953125, %v1568_v48  ;;  %v949_v0 = vmul.f32 0.001953125, %v1569_v50  ;;  %v950_v1 = vmul.f32 0.001953125, %v1570_v51  ;;  %v1573_v3 = vround.rtne.f32 %v441_v53  ;;  %v201_v41 = vld [vmem:[%s2055_s30 + $0x1f8] sm:$0xff] }
  0x5d   : > { %v951_v2 = vmul.f32 0.001953125, %v1571_v52  ;;  %1202 = vst [vmem:[%s2078_s17 + $0x140] sm:$0xff] %v946_v57  ;;  %1203 = vst [vmem:[%s2078_s17 + $0x148] sm:$0xff] %v947_v58  ;;  %v952_v5 = vmul.f32 0.001953125, %v1572_v60  ;;  %v442_v6 = vmul.f32 512.0, %v186_v54  ;;  %v443_v7 = vmul.f32 512.0, %v187_v55 }
  0x5e   : > { %1204 = vst [vmem:[%s2078_s17 + $0x150] sm:$0xff] %v948_v59  ;;  %v444_v8 = vmul.f32 512.0, %v188_v56  ;;  %1205 = vst [vmem:[%s2078_s17 + $0x158] sm:$0xff] %v949_v0  ;;  %v953_v10 = vmul.f32 0.001953125, %v1573_v3  ;;  %v445_v11 = vmul.f32 512.0, %v189_v61  ;;  %v446_v12 = vmul.f32 512.0, %v190_v62 }
  0x5f   : > { %1206 = vst [vmem:[%s2078_s17 + $0x160] sm:$0xff] %v950_v1  ;;  %1207 = vst [vmem:[%s2078_s17 + $0x168] sm:$0xff] %v951_v2  ;;  %v447_v13 = vmul.f32 512.0, %v191_v63  ;;  %v1574_v14 = vround.rtne.f32 %v442_v6  ;;  %v1575_v15 = vround.rtne.f32 %v443_v7  ;;  %v448_v17 = vmul.f32 512.0, %v192_v4  ;;  %v202_v54 = vld [vmem:[%s2055_s30 + $0x200] sm:$0xff]  ;;  %v203_v55 = vld [vmem:[%s2055_s30 + $0x208] sm:$0xff] }
  0x60   : > { %1208 = vst [vmem:[%s2078_s17 + $0x170] sm:$0xff] %v952_v5  ;;  %v1576_v16 = vround.rtne.f32 %v444_v8  ;;  %1209 = vst [vmem:[%s2078_s17 + $0x178] sm:$0xff] %v953_v10  ;;  %v1577_v18 = vround.rtne.f32 %v445_v11  ;;  %v1578_v19 = vround.rtne.f32 %v446_v12  ;;  %v449_v21 = vmul.f32 512.0, %v193_v9  ;;  %v204_v56 = vld [vmem:[%s2055_s30 + $0x210] sm:$0xff]  ;;  %v205_v61 = vld [vmem:[%s2055_s30 + $0x218] sm:$0xff] }
  0x61   : > { %v1579_v20 = vround.rtne.f32 %v447_v13  ;;  %v954_v25 = vmul.f32 0.001953125, %v1574_v14  ;;  %v955_v26 = vmul.f32 0.001953125, %v1575_v15  ;;  %v1580_v28 = vround.rtne.f32 %v448_v17  ;;  %v206_v62 = vld [vmem:[%s2055_s30 + $0x220] sm:$0xff]  ;;  %v207_v63 = vld [vmem:[%s2055_s30 + $0x228] sm:$0xff]  ;;  %v208_v4 = vld [vmem:[%s2055_s30 + $0x230] sm:$0xff] }
  0x62   : > { %v956_v27 = vmul.f32 0.001953125, %v1576_v16  ;;  %v957_v32 = vmul.f32 0.001953125, %v1577_v18  ;;  %v958_v33 = vmul.f32 0.001953125, %v1578_v19  ;;  %v1581_v35 = vround.rtne.f32 %v449_v21  ;;  %v209_v9 = vld [vmem:[%s2055_s30 + $0x238] sm:$0xff] }
  0x63   : > { %v959_v34 = vmul.f32 0.001953125, %v1579_v20  ;;  %1210 = vst [vmem:[%s2078_s17 + $0x180] sm:$0xff] %v954_v25  ;;  %1211 = vst [vmem:[%s2078_s17 + $0x188] sm:$0xff] %v955_v26  ;;  %v960_v37 = vmul.f32 0.001953125, %v1580_v28  ;;  %v450_v38 = vmul.f32 512.0, %v194_v22  ;;  %v451_v39 = vmul.f32 512.0, %v195_v23 }
  0x64   : > { %1212 = vst [vmem:[%s2078_s17 + $0x190] sm:$0xff] %v956_v27  ;;  %v452_v40 = vmul.f32 512.0, %v196_v24  ;;  %1213 = vst [vmem:[%s2078_s17 + $0x198] sm:$0xff] %v957_v32  ;;  %v961_v42 = vmul.f32 0.001953125, %v1581_v35  ;;  %v453_v43 = vmul.f32 512.0, %v197_v29  ;;  %v454_v44 = vmul.f32 512.0, %v198_v30 }
  0x65   : > { %1214 = vst [vmem:[%s2078_s17 + $0x1a0] sm:$0xff] %v958_v33  ;;  %1215 = vst [vmem:[%s2078_s17 + $0x1a8] sm:$0xff] %v959_v34  ;;  %v455_v45 = vmul.f32 512.0, %v199_v31  ;;  %v1582_v46 = vround.rtne.f32 %v450_v38  ;;  %v1583_v47 = vround.rtne.f32 %v451_v39  ;;  %v456_v49 = vmul.f32 512.0, %v200_v36  ;;  %v210_v22 = vld [vmem:[%s2055_s30 + $0x240] sm:$0xff]  ;;  %v211_v23 = vld [vmem:[%s2055_s30 + $0x248] sm:$0xff] }
  0x66   : > { %1216 = vst [vmem:[%s2078_s17 + $0x1b0] sm:$0xff] %v960_v37  ;;  %v1584_v48 = vround.rtne.f32 %v452_v40  ;;  %1217 = vst [vmem:[%s2078_s17 + $0x1b8] sm:$0xff] %v961_v42  ;;  %v1585_v50 = vround.rtne.f32 %v453_v43  ;;  %v1586_v51 = vround.rtne.f32 %v454_v44  ;;  %v457_v53 = vmul.f32 512.0, %v201_v41  ;;  %v212_v24 = vld [vmem:[%s2055_s30 + $0x250] sm:$0xff]  ;;  %v213_v29 = vld [vmem:[%s2055_s30 + $0x258] sm:$0xff] }
  0x67   : > { %v1587_v52 = vround.rtne.f32 %v455_v45  ;;  %v962_v57 = vmul.f32 0.001953125, %v1582_v46  ;;  %v963_v58 = vmul.f32 0.001953125, %v1583_v47  ;;  %v1588_v60 = vround.rtne.f32 %v456_v49  ;;  %v214_v30 = vld [vmem:[%s2055_s30 + $0x260] sm:$0xff]  ;;  %v215_v31 = vld [vmem:[%s2055_s30 + $0x268] sm:$0xff]  ;;  %v216_v36 = vld [vmem:[%s2055_s30 + $0x270] sm:$0xff] }
  0x68   : > { %v964_v59 = vmul.f32 0.001953125, %v1584_v48  ;;  %v965_v0 = vmul.f32 0.001953125, %v1585_v50  ;;  %v966_v1 = vmul.f32 0.001953125, %v1586_v51  ;;  %v1589_v3 = vround.rtne.f32 %v457_v53  ;;  %v217_v41 = vld [vmem:[%s2055_s30 + $0x278] sm:$0xff] }
  0x69   : > { %v967_v2 = vmul.f32 0.001953125, %v1587_v52  ;;  %1218 = vst [vmem:[%s2078_s17 + $0x1c0] sm:$0xff] %v962_v57  ;;  %1219 = vst [vmem:[%s2078_s17 + $0x1c8] sm:$0xff] %v963_v58  ;;  %v968_v5 = vmul.f32 0.001953125, %v1588_v60  ;;  %v458_v6 = vmul.f32 512.0, %v202_v54  ;;  %v459_v7 = vmul.f32 512.0, %v203_v55 }
  0x6a   : > { %1220 = vst [vmem:[%s2078_s17 + $0x1d0] sm:$0xff] %v964_v59  ;;  %v460_v8 = vmul.f32 512.0, %v204_v56  ;;  %1221 = vst [vmem:[%s2078_s17 + $0x1d8] sm:$0xff] %v965_v0  ;;  %v969_v10 = vmul.f32 0.001953125, %v1589_v3  ;;  %v461_v11 = vmul.f32 512.0, %v205_v61  ;;  %v462_v12 = vmul.f32 512.0, %v206_v62 }
  0x6b   : > { %1222 = vst [vmem:[%s2078_s17 + $0x1e0] sm:$0xff] %v966_v1  ;;  %1223 = vst [vmem:[%s2078_s17 + $0x1e8] sm:$0xff] %v967_v2  ;;  %v463_v13 = vmul.f32 512.0, %v207_v63  ;;  %v1590_v14 = vround.rtne.f32 %v458_v6  ;;  %v1591_v15 = vround.rtne.f32 %v459_v7  ;;  %v464_v17 = vmul.f32 512.0, %v208_v4  ;;  %v218_v54 = vld [vmem:[%s2055_s30 + $0x280] sm:$0xff]  ;;  %v219_v55 = vld [vmem:[%s2055_s30 + $0x288] sm:$0xff] }
  0x6c   : > { %1224 = vst [vmem:[%s2078_s17 + $0x1f0] sm:$0xff] %v968_v5  ;;  %v1592_v16 = vround.rtne.f32 %v460_v8  ;;  %1225 = vst [vmem:[%s2078_s17 + $0x1f8] sm:$0xff] %v969_v10  ;;  %v1593_v18 = vround.rtne.f32 %v461_v11  ;;  %v1594_v19 = vround.rtne.f32 %v462_v12  ;;  %v465_v21 = vmul.f32 512.0, %v209_v9  ;;  %v220_v56 = vld [vmem:[%s2055_s30 + $0x290] sm:$0xff]  ;;  %v221_v61 = vld [vmem:[%s2055_s30 + $0x298] sm:$0xff] }
  0x6d   : > { %v1595_v20 = vround.rtne.f32 %v463_v13  ;;  %v970_v25 = vmul.f32 0.001953125, %v1590_v14  ;;  %v971_v26 = vmul.f32 0.001953125, %v1591_v15  ;;  %v1596_v28 = vround.rtne.f32 %v464_v17  ;;  %v222_v62 = vld [vmem:[%s2055_s30 + $0x2a0] sm:$0xff]  ;;  %v223_v63 = vld [vmem:[%s2055_s30 + $0x2a8] sm:$0xff]  ;;  %v224_v4 = vld [vmem:[%s2055_s30 + $0x2b0] sm:$0xff] }
  0x6e   : > { %v972_v27 = vmul.f32 0.001953125, %v1592_v16  ;;  %v973_v32 = vmul.f32 0.001953125, %v1593_v18  ;;  %v974_v33 = vmul.f32 0.001953125, %v1594_v19  ;;  %v1597_v35 = vround.rtne.f32 %v465_v21  ;;  %v225_v9 = vld [vmem:[%s2055_s30 + $0x2b8] sm:$0xff] }
  0x6f   : > { %v975_v34 = vmul.f32 0.001953125, %v1595_v20  ;;  %1226 = vst [vmem:[%s2078_s17 + $0x200] sm:$0xff] %v970_v25  ;;  %1227 = vst [vmem:[%s2078_s17 + $0x208] sm:$0xff] %v971_v26  ;;  %v976_v37 = vmul.f32 0.001953125, %v1596_v28  ;;  %v466_v38 = vmul.f32 512.0, %v210_v22  ;;  %v467_v39 = vmul.f32 512.0, %v211_v23 }
  0x70   : > { %1228 = vst [vmem:[%s2078_s17 + $0x210] sm:$0xff] %v972_v27  ;;  %v468_v40 = vmul.f32 512.0, %v212_v24  ;;  %1229 = vst [vmem:[%s2078_s17 + $0x218] sm:$0xff] %v973_v32  ;;  %v977_v42 = vmul.f32 0.001953125, %v1597_v35  ;;  %v469_v43 = vmul.f32 512.0, %v213_v29  ;;  %v470_v44 = vmul.f32 512.0, %v214_v30 }
  0x71   : > { %1230 = vst [vmem:[%s2078_s17 + $0x220] sm:$0xff] %v974_v33  ;;  %1231 = vst [vmem:[%s2078_s17 + $0x228] sm:$0xff] %v975_v34  ;;  %v471_v45 = vmul.f32 512.0, %v215_v31  ;;  %v1598_v46 = vround.rtne.f32 %v466_v38  ;;  %v1599_v47 = vround.rtne.f32 %v467_v39  ;;  %v472_v49 = vmul.f32 512.0, %v216_v36  ;;  %v226_v22 = vld [vmem:[%s2055_s30 + $0x2c0] sm:$0xff]  ;;  %v227_v23 = vld [vmem:[%s2055_s30 + $0x2c8] sm:$0xff] }
  0x72   : > { %1232 = vst [vmem:[%s2078_s17 + $0x230] sm:$0xff] %v976_v37  ;;  %v1600_v48 = vround.rtne.f32 %v468_v40  ;;  %1233 = vst [vmem:[%s2078_s17 + $0x238] sm:$0xff] %v977_v42  ;;  %v1601_v50 = vround.rtne.f32 %v469_v43  ;;  %v1602_v51 = vround.rtne.f32 %v470_v44  ;;  %v473_v53 = vmul.f32 512.0, %v217_v41  ;;  %v228_v24 = vld [vmem:[%s2055_s30 + $0x2d0] sm:$0xff]  ;;  %v229_v29 = vld [vmem:[%s2055_s30 + $0x2d8] sm:$0xff] }
  0x73   : > { %v1603_v52 = vround.rtne.f32 %v471_v45  ;;  %v978_v57 = vmul.f32 0.001953125, %v1598_v46  ;;  %v979_v58 = vmul.f32 0.001953125, %v1599_v47  ;;  %v1604_v60 = vround.rtne.f32 %v472_v49  ;;  %v230_v30 = vld [vmem:[%s2055_s30 + $0x2e0] sm:$0xff]  ;;  %v231_v31 = vld [vmem:[%s2055_s30 + $0x2e8] sm:$0xff]  ;;  %v232_v36 = vld [vmem:[%s2055_s30 + $0x2f0] sm:$0xff] }
  0x74   : > { %v980_v59 = vmul.f32 0.001953125, %v1600_v48  ;;  %v981_v0 = vmul.f32 0.001953125, %v1601_v50  ;;  %v982_v1 = vmul.f32 0.001953125, %v1602_v51  ;;  %v1605_v3 = vround.rtne.f32 %v473_v53  ;;  %v233_v41 = vld [vmem:[%s2055_s30 + $0x2f8] sm:$0xff] }
  0x75   : > { %v983_v2 = vmul.f32 0.001953125, %v1603_v52  ;;  %1234 = vst [vmem:[%s2078_s17 + $0x240] sm:$0xff] %v978_v57  ;;  %1235 = vst [vmem:[%s2078_s17 + $0x248] sm:$0xff] %v979_v58  ;;  %v984_v5 = vmul.f32 0.001953125, %v1604_v60  ;;  %v474_v6 = vmul.f32 512.0, %v218_v54  ;;  %v475_v7 = vmul.f32 512.0, %v219_v55 }
  0x76   : > { %1236 = vst [vmem:[%s2078_s17 + $0x250] sm:$0xff] %v980_v59  ;;  %v476_v8 = vmul.f32 512.0, %v220_v56  ;;  %1237 = vst [vmem:[%s2078_s17 + $0x258] sm:$0xff] %v981_v0  ;;  %v985_v10 = vmul.f32 0.001953125, %v1605_v3  ;;  %v477_v11 = vmul.f32 512.0, %v221_v61  ;;  %v478_v12 = vmul.f32 512.0, %v222_v62 }
  0x77   : > { %1238 = vst [vmem:[%s2078_s17 + $0x260] sm:$0xff] %v982_v1  ;;  %1239 = vst [vmem:[%s2078_s17 + $0x268] sm:$0xff] %v983_v2  ;;  %v479_v13 = vmul.f32 512.0, %v223_v63  ;;  %v1606_v14 = vround.rtne.f32 %v474_v6  ;;  %v1607_v15 = vround.rtne.f32 %v475_v7  ;;  %v480_v17 = vmul.f32 512.0, %v224_v4  ;;  %v234_v54 = vld [vmem:[%s2055_s30 + $0x300] sm:$0xff]  ;;  %v235_v55 = vld [vmem:[%s2055_s30 + $0x308] sm:$0xff] }
  0x78   : > { %1240 = vst [vmem:[%s2078_s17 + $0x270] sm:$0xff] %v984_v5  ;;  %v1608_v16 = vround.rtne.f32 %v476_v8  ;;  %1241 = vst [vmem:[%s2078_s17 + $0x278] sm:$0xff] %v985_v10  ;;  %v1609_v18 = vround.rtne.f32 %v477_v11  ;;  %v1610_v19 = vround.rtne.f32 %v478_v12  ;;  %v481_v21 = vmul.f32 512.0, %v225_v9  ;;  %v236_v56 = vld [vmem:[%s2055_s30 + $0x310] sm:$0xff]  ;;  %v237_v61 = vld [vmem:[%s2055_s30 + $0x318] sm:$0xff] }
  0x79   : > { %v1611_v20 = vround.rtne.f32 %v479_v13  ;;  %v986_v25 = vmul.f32 0.001953125, %v1606_v14  ;;  %v987_v26 = vmul.f32 0.001953125, %v1607_v15  ;;  %v1612_v28 = vround.rtne.f32 %v480_v17  ;;  %v238_v62 = vld [vmem:[%s2055_s30 + $0x320] sm:$0xff]  ;;  %v239_v63 = vld [vmem:[%s2055_s30 + $0x328] sm:$0xff]  ;;  %v240_v4 = vld [vmem:[%s2055_s30 + $0x330] sm:$0xff] }
  0x7a   : > { %v988_v27 = vmul.f32 0.001953125, %v1608_v16  ;;  %v989_v32 = vmul.f32 0.001953125, %v1609_v18  ;;  %v990_v33 = vmul.f32 0.001953125, %v1610_v19  ;;  %v1613_v35 = vround.rtne.f32 %v481_v21  ;;  %v241_v9 = vld [vmem:[%s2055_s30 + $0x338] sm:$0xff] }
  0x7b   : > { %v991_v34 = vmul.f32 0.001953125, %v1611_v20  ;;  %1242 = vst [vmem:[%s2078_s17 + $0x280] sm:$0xff] %v986_v25  ;;  %1243 = vst [vmem:[%s2078_s17 + $0x288] sm:$0xff] %v987_v26  ;;  %v992_v37 = vmul.f32 0.001953125, %v1612_v28  ;;  %v482_v38 = vmul.f32 512.0, %v226_v22  ;;  %v483_v39 = vmul.f32 512.0, %v227_v23 }
  0x7c   : > { %1244 = vst [vmem:[%s2078_s17 + $0x290] sm:$0xff] %v988_v27  ;;  %v484_v40 = vmul.f32 512.0, %v228_v24  ;;  %1245 = vst [vmem:[%s2078_s17 + $0x298] sm:$0xff] %v989_v32  ;;  %v993_v42 = vmul.f32 0.001953125, %v1613_v35  ;;  %v485_v43 = vmul.f32 512.0, %v229_v29  ;;  %v486_v44 = vmul.f32 512.0, %v230_v30 }
  0x7d   : > { %1246 = vst [vmem:[%s2078_s17 + $0x2a0] sm:$0xff] %v990_v33  ;;  %1247 = vst [vmem:[%s2078_s17 + $0x2a8] sm:$0xff] %v991_v34  ;;  %v487_v45 = vmul.f32 512.0, %v231_v31  ;;  %v1614_v46 = vround.rtne.f32 %v482_v38  ;;  %v1615_v47 = vround.rtne.f32 %v483_v39  ;;  %v488_v49 = vmul.f32 512.0, %v232_v36  ;;  %v242_v22 = vld [vmem:[%s2055_s30 + $0x340] sm:$0xff]  ;;  %v243_v23 = vld [vmem:[%s2055_s30 + $0x348] sm:$0xff] }
  0x7e   : > { %1248 = vst [vmem:[%s2078_s17 + $0x2b0] sm:$0xff] %v992_v37  ;;  %v1616_v48 = vround.rtne.f32 %v484_v40  ;;  %1249 = vst [vmem:[%s2078_s17 + $0x2b8] sm:$0xff] %v993_v42  ;;  %v1617_v50 = vround.rtne.f32 %v485_v43  ;;  %v1618_v51 = vround.rtne.f32 %v486_v44  ;;  %v489_v53 = vmul.f32 512.0, %v233_v41  ;;  %v244_v24 = vld [vmem:[%s2055_s30 + $0x350] sm:$0xff]  ;;  %v245_v29 = vld [vmem:[%s2055_s30 + $0x358] sm:$0xff] }
  0x7f   : > { %v1619_v52 = vround.rtne.f32 %v487_v45  ;;  %v994_v57 = vmul.f32 0.001953125, %v1614_v46  ;;  %v995_v58 = vmul.f32 0.001953125, %v1615_v47  ;;  %v1620_v60 = vround.rtne.f32 %v488_v49  ;;  %v246_v30 = vld [vmem:[%s2055_s30 + $0x360] sm:$0xff]  ;;  %v247_v31 = vld [vmem:[%s2055_s30 + $0x368] sm:$0xff]  ;;  %v248_v36 = vld [vmem:[%s2055_s30 + $0x370] sm:$0xff] }
  0x80   : > { %v996_v59 = vmul.f32 0.001953125, %v1616_v48  ;;  %v997_v0 = vmul.f32 0.001953125, %v1617_v50  ;;  %v998_v1 = vmul.f32 0.001953125, %v1618_v51  ;;  %v1621_v3 = vround.rtne.f32 %v489_v53  ;;  %v249_v41 = vld [vmem:[%s2055_s30 + $0x378] sm:$0xff] }
  0x81   : > { %v999_v2 = vmul.f32 0.001953125, %v1619_v52  ;;  %1250 = vst [vmem:[%s2078_s17 + $0x2c0] sm:$0xff] %v994_v57  ;;  %1251 = vst [vmem:[%s2078_s17 + $0x2c8] sm:$0xff] %v995_v58  ;;  %v1000_v5 = vmul.f32 0.001953125, %v1620_v60  ;;  %v490_v6 = vmul.f32 512.0, %v234_v54  ;;  %v491_v7 = vmul.f32 512.0, %v235_v55 }
  0x82   : > { %1252 = vst [vmem:[%s2078_s17 + $0x2d0] sm:$0xff] %v996_v59  ;;  %v492_v8 = vmul.f32 512.0, %v236_v56  ;;  %1253 = vst [vmem:[%s2078_s17 + $0x2d8] sm:$0xff] %v997_v0  ;;  %v1001_v10 = vmul.f32 0.001953125, %v1621_v3  ;;  %v493_v11 = vmul.f32 512.0, %v237_v61  ;;  %v494_v12 = vmul.f32 512.0, %v238_v62 }
  0x83   : > { %1254 = vst [vmem:[%s2078_s17 + $0x2e0] sm:$0xff] %v998_v1  ;;  %1255 = vst [vmem:[%s2078_s17 + $0x2e8] sm:$0xff] %v999_v2  ;;  %v495_v13 = vmul.f32 512.0, %v239_v63  ;;  %v1622_v14 = vround.rtne.f32 %v490_v6  ;;  %v1623_v15 = vround.rtne.f32 %v491_v7  ;;  %v496_v17 = vmul.f32 512.0, %v240_v4  ;;  %v250_v54 = vld [vmem:[%s2055_s30 + $0x380] sm:$0xff]  ;;  %v251_v55 = vld [vmem:[%s2055_s30 + $0x388] sm:$0xff] }
  0x84   : > { %1256 = vst [vmem:[%s2078_s17 + $0x2f0] sm:$0xff] %v1000_v5  ;;  %v1624_v16 = vround.rtne.f32 %v492_v8  ;;  %1257 = vst [vmem:[%s2078_s17 + $0x2f8] sm:$0xff] %v1001_v10  ;;  %v1625_v18 = vround.rtne.f32 %v493_v11  ;;  %v1626_v19 = vround.rtne.f32 %v494_v12  ;;  %v497_v21 = vmul.f32 512.0, %v241_v9  ;;  %v252_v56 = vld [vmem:[%s2055_s30 + $0x390] sm:$0xff]  ;;  %v253_v61 = vld [vmem:[%s2055_s30 + $0x398] sm:$0xff] }
  0x85   : > { %v1627_v20 = vround.rtne.f32 %v495_v13  ;;  %v1002_v25 = vmul.f32 0.001953125, %v1622_v14  ;;  %v1003_v26 = vmul.f32 0.001953125, %v1623_v15  ;;  %v1628_v28 = vround.rtne.f32 %v496_v17  ;;  %v254_v62 = vld [vmem:[%s2055_s30 + $0x3a0] sm:$0xff]  ;;  %v255_v63 = vld [vmem:[%s2055_s30 + $0x3a8] sm:$0xff]  ;;  %v256_v4 = vld [vmem:[%s2055_s30 + $0x3b0] sm:$0xff] }
  0x86   : > { %v1004_v27 = vmul.f32 0.001953125, %v1624_v16  ;;  %v1005_v32 = vmul.f32 0.001953125, %v1625_v18  ;;  %v1006_v33 = vmul.f32 0.001953125, %v1626_v19  ;;  %v1629_v35 = vround.rtne.f32 %v497_v21  ;;  %v257_v9 = vld [vmem:[%s2055_s30 + $0x3b8] sm:$0xff] }
  0x87   : > { %v1007_v34 = vmul.f32 0.001953125, %v1627_v20  ;;  %1258 = vst [vmem:[%s2078_s17 + $0x300] sm:$0xff] %v1002_v25  ;;  %1259 = vst [vmem:[%s2078_s17 + $0x308] sm:$0xff] %v1003_v26  ;;  %v1008_v37 = vmul.f32 0.001953125, %v1628_v28  ;;  %v498_v38 = vmul.f32 512.0, %v242_v22  ;;  %v499_v39 = vmul.f32 512.0, %v243_v23 }
  0x88   : > { %1260 = vst [vmem:[%s2078_s17 + $0x310] sm:$0xff] %v1004_v27  ;;  %v500_v40 = vmul.f32 512.0, %v244_v24  ;;  %1261 = vst [vmem:[%s2078_s17 + $0x318] sm:$0xff] %v1005_v32  ;;  %v1009_v42 = vmul.f32 0.001953125, %v1629_v35  ;;  %v501_v43 = vmul.f32 512.0, %v245_v29  ;;  %v502_v44 = vmul.f32 512.0, %v246_v30 }
  0x89   : > { %1262 = vst [vmem:[%s2078_s17 + $0x320] sm:$0xff] %v1006_v33  ;;  %1263 = vst [vmem:[%s2078_s17 + $0x328] sm:$0xff] %v1007_v34  ;;  %v503_v45 = vmul.f32 512.0, %v247_v31  ;;  %v1630_v46 = vround.rtne.f32 %v498_v38  ;;  %v1631_v47 = vround.rtne.f32 %v499_v39  ;;  %v504_v49 = vmul.f32 512.0, %v248_v36  ;;  %v258_v22 = vld [vmem:[%s2055_s30 + $0x3c0] sm:$0xff]  ;;  %v259_v23 = vld [vmem:[%s2055_s30 + $0x3c8] sm:$0xff] }
  0x8a   : > { %1264 = vst [vmem:[%s2078_s17 + $0x330] sm:$0xff] %v1008_v37  ;;  %v1632_v48 = vround.rtne.f32 %v500_v40  ;;  %1265 = vst [vmem:[%s2078_s17 + $0x338] sm:$0xff] %v1009_v42  ;;  %v1633_v50 = vround.rtne.f32 %v501_v43  ;;  %v1634_v51 = vround.rtne.f32 %v502_v44  ;;  %v505_v53 = vmul.f32 512.0, %v249_v41  ;;  %v260_v24 = vld [vmem:[%s2055_s30 + $0x3d0] sm:$0xff]  ;;  %v261_v29 = vld [vmem:[%s2055_s30 + $0x3d8] sm:$0xff] }
  0x8b   : > { %v1635_v52 = vround.rtne.f32 %v503_v45  ;;  %v1010_v57 = vmul.f32 0.001953125, %v1630_v46  ;;  %v1011_v58 = vmul.f32 0.001953125, %v1631_v47  ;;  %v1636_v60 = vround.rtne.f32 %v504_v49  ;;  %v262_v30 = vld [vmem:[%s2055_s30 + $0x3e0] sm:$0xff]  ;;  %v263_v31 = vld [vmem:[%s2055_s30 + $0x3e8] sm:$0xff]  ;;  %v264_v36 = vld [vmem:[%s2055_s30 + $0x3f0] sm:$0xff] }
  0x8c   : > { %v1012_v59 = vmul.f32 0.001953125, %v1632_v48  ;;  %v1013_v0 = vmul.f32 0.001953125, %v1633_v50  ;;  %v1014_v1 = vmul.f32 0.001953125, %v1634_v51  ;;  %v1637_v3 = vround.rtne.f32 %v505_v53  ;;  %v265_v41 = vld [vmem:[%s2055_s30 + $0x3f8] sm:$0xff] }
  0x8d   : > { %v1015_v2 = vmul.f32 0.001953125, %v1635_v52  ;;  %1266 = vst [vmem:[%s2078_s17 + $0x340] sm:$0xff] %v1010_v57  ;;  %1267 = vst [vmem:[%s2078_s17 + $0x348] sm:$0xff] %v1011_v58  ;;  %v1016_v5 = vmul.f32 0.001953125, %v1636_v60  ;;  %v506_v6 = vmul.f32 512.0, %v250_v54  ;;  %v507_v7 = vmul.f32 512.0, %v251_v55 }
  0x8e   : > { %1268 = vst [vmem:[%s2078_s17 + $0x350] sm:$0xff] %v1012_v59  ;;  %v508_v8 = vmul.f32 512.0, %v252_v56  ;;  %1269 = vst [vmem:[%s2078_s17 + $0x358] sm:$0xff] %v1013_v0  ;;  %v1017_v10 = vmul.f32 0.001953125, %v1637_v3  ;;  %v509_v11 = vmul.f32 512.0, %v253_v61  ;;  %v510_v12 = vmul.f32 512.0, %v254_v62 }
  0x8f   : > { %1270 = vst [vmem:[%s2078_s17 + $0x360] sm:$0xff] %v1014_v1  ;;  %1271 = vst [vmem:[%s2078_s17 + $0x368] sm:$0xff] %v1015_v2  ;;  %v511_v13 = vmul.f32 512.0, %v255_v63  ;;  %v1638_v14 = vround.rtne.f32 %v506_v6  ;;  %v1639_v15 = vround.rtne.f32 %v507_v7  ;;  %v512_v17 = vmul.f32 512.0, %v256_v4  ;;  %v266_v54 = vld [vmem:[%s2055_s30 + $0x400] sm:$0xff]  ;;  %v267_v55 = vld [vmem:[%s2055_s30 + $0x408] sm:$0xff] }
  0x90   : > { %1272 = vst [vmem:[%s2078_s17 + $0x370] sm:$0xff] %v1016_v5  ;;  %v1640_v16 = vround.rtne.f32 %v508_v8  ;;  %1273 = vst [vmem:[%s2078_s17 + $0x378] sm:$0xff] %v1017_v10  ;;  %v1641_v18 = vround.rtne.f32 %v509_v11  ;;  %v1642_v19 = vround.rtne.f32 %v510_v12  ;;  %v513_v21 = vmul.f32 512.0, %v257_v9  ;;  %v268_v56 = vld [vmem:[%s2055_s30 + $0x410] sm:$0xff]  ;;  %v269_v61 = vld [vmem:[%s2055_s30 + $0x418] sm:$0xff] }
  0x91   : > { %v1643_v20 = vround.rtne.f32 %v511_v13  ;;  %v1018_v25 = vmul.f32 0.001953125, %v1638_v14  ;;  %v1019_v26 = vmul.f32 0.001953125, %v1639_v15  ;;  %v1644_v28 = vround.rtne.f32 %v512_v17  ;;  %v270_v62 = vld [vmem:[%s2055_s30 + $0x420] sm:$0xff]  ;;  %v271_v63 = vld [vmem:[%s2055_s30 + $0x428] sm:$0xff]  ;;  %v272_v4 = vld [vmem:[%s2055_s30 + $0x430] sm:$0xff] }
  0x92   : > { %v1020_v27 = vmul.f32 0.001953125, %v1640_v16  ;;  %v1021_v32 = vmul.f32 0.001953125, %v1641_v18  ;;  %v1022_v33 = vmul.f32 0.001953125, %v1642_v19  ;;  %v1645_v35 = vround.rtne.f32 %v513_v21  ;;  %v273_v9 = vld [vmem:[%s2055_s30 + $0x438] sm:$0xff] }
  0x93   : > { %v1023_v34 = vmul.f32 0.001953125, %v1643_v20  ;;  %1274 = vst [vmem:[%s2078_s17 + $0x380] sm:$0xff] %v1018_v25  ;;  %1275 = vst [vmem:[%s2078_s17 + $0x388] sm:$0xff] %v1019_v26  ;;  %v1024_v37 = vmul.f32 0.001953125, %v1644_v28  ;;  %v514_v38 = vmul.f32 512.0, %v258_v22  ;;  %v515_v39 = vmul.f32 512.0, %v259_v23 }
  0x94   : > { %1276 = vst [vmem:[%s2078_s17 + $0x390] sm:$0xff] %v1020_v27  ;;  %v516_v40 = vmul.f32 512.0, %v260_v24  ;;  %1277 = vst [vmem:[%s2078_s17 + $0x398] sm:$0xff] %v1021_v32  ;;  %v1025_v42 = vmul.f32 0.001953125, %v1645_v35  ;;  %v517_v43 = vmul.f32 512.0, %v261_v29  ;;  %v518_v44 = vmul.f32 512.0, %v262_v30 }
  0x95   : > { %1278 = vst [vmem:[%s2078_s17 + $0x3a0] sm:$0xff] %v1022_v33  ;;  %1279 = vst [vmem:[%s2078_s17 + $0x3a8] sm:$0xff] %v1023_v34  ;;  %v519_v45 = vmul.f32 512.0, %v263_v31  ;;  %v1646_v46 = vround.rtne.f32 %v514_v38  ;;  %v1647_v47 = vround.rtne.f32 %v515_v39  ;;  %v520_v49 = vmul.f32 512.0, %v264_v36  ;;  %v274_v22 = vld [vmem:[%s2055_s30 + $0x440] sm:$0xff]  ;;  %v275_v23 = vld [vmem:[%s2055_s30 + $0x448] sm:$0xff] }
  0x96   : > { %1280 = vst [vmem:[%s2078_s17 + $0x3b0] sm:$0xff] %v1024_v37  ;;  %v1648_v48 = vround.rtne.f32 %v516_v40  ;;  %1281 = vst [vmem:[%s2078_s17 + $0x3b8] sm:$0xff] %v1025_v42  ;;  %v1649_v50 = vround.rtne.f32 %v517_v43  ;;  %v1650_v51 = vround.rtne.f32 %v518_v44  ;;  %v521_v53 = vmul.f32 512.0, %v265_v41  ;;  %v276_v24 = vld [vmem:[%s2055_s30 + $0x450] sm:$0xff]  ;;  %v277_v29 = vld [vmem:[%s2055_s30 + $0x458] sm:$0xff] }
  0x97   : > { %v1651_v52 = vround.rtne.f32 %v519_v45  ;;  %v1026_v57 = vmul.f32 0.001953125, %v1646_v46  ;;  %v1027_v58 = vmul.f32 0.001953125, %v1647_v47  ;;  %v1652_v60 = vround.rtne.f32 %v520_v49  ;;  %v278_v30 = vld [vmem:[%s2055_s30 + $0x460] sm:$0xff]  ;;  %v279_v31 = vld [vmem:[%s2055_s30 + $0x468] sm:$0xff]  ;;  %v280_v36 = vld [vmem:[%s2055_s30 + $0x470] sm:$0xff] }
  0x98   : > { %v1028_v59 = vmul.f32 0.001953125, %v1648_v48  ;;  %v1029_v0 = vmul.f32 0.001953125, %v1649_v50  ;;  %v1030_v1 = vmul.f32 0.001953125, %v1650_v51  ;;  %v1653_v3 = vround.rtne.f32 %v521_v53  ;;  %v281_v41 = vld [vmem:[%s2055_s30 + $0x478] sm:$0xff] }
  0x99   : > { %v1031_v2 = vmul.f32 0.001953125, %v1651_v52  ;;  %1282 = vst [vmem:[%s2078_s17 + $0x3c0] sm:$0xff] %v1026_v57  ;;  %1283 = vst [vmem:[%s2078_s17 + $0x3c8] sm:$0xff] %v1027_v58  ;;  %v1032_v5 = vmul.f32 0.001953125, %v1652_v60  ;;  %v522_v6 = vmul.f32 512.0, %v266_v54  ;;  %v523_v7 = vmul.f32 512.0, %v267_v55 }
  0x9a   : > { %1284 = vst [vmem:[%s2078_s17 + $0x3d0] sm:$0xff] %v1028_v59  ;;  %v524_v8 = vmul.f32 512.0, %v268_v56  ;;  %1285 = vst [vmem:[%s2078_s17 + $0x3d8] sm:$0xff] %v1029_v0  ;;  %v1033_v10 = vmul.f32 0.001953125, %v1653_v3  ;;  %v525_v11 = vmul.f32 512.0, %v269_v61  ;;  %v526_v12 = vmul.f32 512.0, %v270_v62 }
  0x9b   : > { %1286 = vst [vmem:[%s2078_s17 + $0x3e0] sm:$0xff] %v1030_v1  ;;  %1287 = vst [vmem:[%s2078_s17 + $0x3e8] sm:$0xff] %v1031_v2  ;;  %v527_v13 = vmul.f32 512.0, %v271_v63  ;;  %v1654_v14 = vround.rtne.f32 %v522_v6  ;;  %v1655_v15 = vround.rtne.f32 %v523_v7  ;;  %v528_v17 = vmul.f32 512.0, %v272_v4  ;;  %v282_v54 = vld [vmem:[%s2055_s30 + $0x480] sm:$0xff]  ;;  %v283_v55 = vld [vmem:[%s2055_s30 + $0x488] sm:$0xff] }
  0x9c   : > { %1288 = vst [vmem:[%s2078_s17 + $0x3f0] sm:$0xff] %v1032_v5  ;;  %v1656_v16 = vround.rtne.f32 %v524_v8  ;;  %1289 = vst [vmem:[%s2078_s17 + $0x3f8] sm:$0xff] %v1033_v10  ;;  %v1657_v18 = vround.rtne.f32 %v525_v11  ;;  %v1658_v19 = vround.rtne.f32 %v526_v12  ;;  %v529_v21 = vmul.f32 512.0, %v273_v9  ;;  %v284_v56 = vld [vmem:[%s2055_s30 + $0x490] sm:$0xff]  ;;  %v285_v61 = vld [vmem:[%s2055_s30 + $0x498] sm:$0xff] }
  0x9d   : > { %v1659_v20 = vround.rtne.f32 %v527_v13  ;;  %v1034_v25 = vmul.f32 0.001953125, %v1654_v14  ;;  %v1035_v26 = vmul.f32 0.001953125, %v1655_v15  ;;  %v1660_v28 = vround.rtne.f32 %v528_v17  ;;  %v286_v62 = vld [vmem:[%s2055_s30 + $0x4a0] sm:$0xff]  ;;  %v287_v63 = vld [vmem:[%s2055_s30 + $0x4a8] sm:$0xff]  ;;  %v288_v4 = vld [vmem:[%s2055_s30 + $0x4b0] sm:$0xff] }
  0x9e   : > { %v1036_v27 = vmul.f32 0.001953125, %v1656_v16  ;;  %v1037_v32 = vmul.f32 0.001953125, %v1657_v18  ;;  %v1038_v33 = vmul.f32 0.001953125, %v1658_v19  ;;  %v1661_v35 = vround.rtne.f32 %v529_v21  ;;  %v289_v9 = vld [vmem:[%s2055_s30 + $0x4b8] sm:$0xff] }
  0x9f   : > { %v1039_v34 = vmul.f32 0.001953125, %v1659_v20  ;;  %1290 = vst [vmem:[%s2078_s17 + $0x400] sm:$0xff] %v1034_v25  ;;  %1291 = vst [vmem:[%s2078_s17 + $0x408] sm:$0xff] %v1035_v26  ;;  %v1040_v37 = vmul.f32 0.001953125, %v1660_v28  ;;  %v530_v38 = vmul.f32 512.0, %v274_v22  ;;  %v531_v39 = vmul.f32 512.0, %v275_v23 }
  0xa0   : > { %1292 = vst [vmem:[%s2078_s17 + $0x410] sm:$0xff] %v1036_v27  ;;  %v532_v40 = vmul.f32 512.0, %v276_v24  ;;  %1293 = vst [vmem:[%s2078_s17 + $0x418] sm:$0xff] %v1037_v32  ;;  %v1041_v42 = vmul.f32 0.001953125, %v1661_v35  ;;  %v533_v43 = vmul.f32 512.0, %v277_v29  ;;  %v534_v44 = vmul.f32 512.0, %v278_v30 }
  0xa1   : > { %1294 = vst [vmem:[%s2078_s17 + $0x420] sm:$0xff] %v1038_v33  ;;  %1295 = vst [vmem:[%s2078_s17 + $0x428] sm:$0xff] %v1039_v34  ;;  %v535_v45 = vmul.f32 512.0, %v279_v31  ;;  %v1662_v46 = vround.rtne.f32 %v530_v38  ;;  %v1663_v47 = vround.rtne.f32 %v531_v39  ;;  %v536_v49 = vmul.f32 512.0, %v280_v36  ;;  %v290_v22 = vld [vmem:[%s2055_s30 + $0x4c0] sm:$0xff]  ;;  %v291_v23 = vld [vmem:[%s2055_s30 + $0x4c8] sm:$0xff] }
  0xa2   : > { %1296 = vst [vmem:[%s2078_s17 + $0x430] sm:$0xff] %v1040_v37  ;;  %v1664_v48 = vround.rtne.f32 %v532_v40  ;;  %1297 = vst [vmem:[%s2078_s17 + $0x438] sm:$0xff] %v1041_v42  ;;  %v1665_v50 = vround.rtne.f32 %v533_v43  ;;  %v1666_v51 = vround.rtne.f32 %v534_v44  ;;  %v537_v53 = vmul.f32 512.0, %v281_v41  ;;  %v292_v24 = vld [vmem:[%s2055_s30 + $0x4d0] sm:$0xff]  ;;  %v293_v29 = vld [vmem:[%s2055_s30 + $0x4d8] sm:$0xff] }
  0xa3   : > { %v1667_v52 = vround.rtne.f32 %v535_v45  ;;  %v1042_v57 = vmul.f32 0.001953125, %v1662_v46  ;;  %v1043_v58 = vmul.f32 0.001953125, %v1663_v47  ;;  %v1668_v60 = vround.rtne.f32 %v536_v49  ;;  %v294_v30 = vld [vmem:[%s2055_s30 + $0x4e0] sm:$0xff]  ;;  %v295_v31 = vld [vmem:[%s2055_s30 + $0x4e8] sm:$0xff]  ;;  %v296_v36 = vld [vmem:[%s2055_s30 + $0x4f0] sm:$0xff] }
  0xa4   : > { %v1044_v59 = vmul.f32 0.001953125, %v1664_v48  ;;  %v1045_v0 = vmul.f32 0.001953125, %v1665_v50  ;;  %v1046_v1 = vmul.f32 0.001953125, %v1666_v51  ;;  %v1669_v3 = vround.rtne.f32 %v537_v53  ;;  %v297_v41 = vld [vmem:[%s2055_s30 + $0x4f8] sm:$0xff] }
  0xa5   : > { %v1047_v2 = vmul.f32 0.001953125, %v1667_v52  ;;  %1298 = vst [vmem:[%s2078_s17 + $0x440] sm:$0xff] %v1042_v57  ;;  %1299 = vst [vmem:[%s2078_s17 + $0x448] sm:$0xff] %v1043_v58  ;;  %v1048_v5 = vmul.f32 0.001953125, %v1668_v60  ;;  %v538_v6 = vmul.f32 512.0, %v282_v54  ;;  %v539_v7 = vmul.f32 512.0, %v283_v55 }
  0xa6   : > { %1300 = vst [vmem:[%s2078_s17 + $0x450] sm:$0xff] %v1044_v59  ;;  %v540_v8 = vmul.f32 512.0, %v284_v56  ;;  %1301 = vst [vmem:[%s2078_s17 + $0x458] sm:$0xff] %v1045_v0  ;;  %v1049_v10 = vmul.f32 0.001953125, %v1669_v3  ;;  %v541_v11 = vmul.f32 512.0, %v285_v61  ;;  %v542_v12 = vmul.f32 512.0, %v286_v62 }
  0xa7   : > { %1302 = vst [vmem:[%s2078_s17 + $0x460] sm:$0xff] %v1046_v1  ;;  %1303 = vst [vmem:[%s2078_s17 + $0x468] sm:$0xff] %v1047_v2  ;;  %v543_v13 = vmul.f32 512.0, %v287_v63  ;;  %v1670_v14 = vround.rtne.f32 %v538_v6  ;;  %v1671_v15 = vround.rtne.f32 %v539_v7  ;;  %v544_v17 = vmul.f32 512.0, %v288_v4  ;;  %v298_v54 = vld [vmem:[%s2055_s30 + $0x500] sm:$0xff]  ;;  %v299_v55 = vld [vmem:[%s2055_s30 + $0x508] sm:$0xff] }
  0xa8   : > { %1304 = vst [vmem:[%s2078_s17 + $0x470] sm:$0xff] %v1048_v5  ;;  %v1672_v16 = vround.rtne.f32 %v540_v8  ;;  %1305 = vst [vmem:[%s2078_s17 + $0x478] sm:$0xff] %v1049_v10  ;;  %v1673_v18 = vround.rtne.f32 %v541_v11  ;;  %v1674_v19 = vround.rtne.f32 %v542_v12  ;;  %v545_v21 = vmul.f32 512.0, %v289_v9  ;;  %v300_v56 = vld [vmem:[%s2055_s30 + $0x510] sm:$0xff]  ;;  %v301_v61 = vld [vmem:[%s2055_s30 + $0x518] sm:$0xff] }
  0xa9   : > { %v1675_v20 = vround.rtne.f32 %v543_v13  ;;  %v1050_v25 = vmul.f32 0.001953125, %v1670_v14  ;;  %v1051_v26 = vmul.f32 0.001953125, %v1671_v15  ;;  %v1676_v28 = vround.rtne.f32 %v544_v17  ;;  %v302_v62 = vld [vmem:[%s2055_s30 + $0x520] sm:$0xff]  ;;  %v303_v63 = vld [vmem:[%s2055_s30 + $0x528] sm:$0xff]  ;;  %v304_v4 = vld [vmem:[%s2055_s30 + $0x530] sm:$0xff] }
  0xaa   : > { %v1052_v27 = vmul.f32 0.001953125, %v1672_v16  ;;  %v1053_v32 = vmul.f32 0.001953125, %v1673_v18  ;;  %v1054_v33 = vmul.f32 0.001953125, %v1674_v19  ;;  %v1677_v35 = vround.rtne.f32 %v545_v21  ;;  %v305_v9 = vld [vmem:[%s2055_s30 + $0x538] sm:$0xff] }
  0xab   : > { %v1055_v34 = vmul.f32 0.001953125, %v1675_v20  ;;  %1306 = vst [vmem:[%s2078_s17 + $0x480] sm:$0xff] %v1050_v25  ;;  %1307 = vst [vmem:[%s2078_s17 + $0x488] sm:$0xff] %v1051_v26  ;;  %v1056_v37 = vmul.f32 0.001953125, %v1676_v28  ;;  %v546_v38 = vmul.f32 512.0, %v290_v22  ;;  %v547_v39 = vmul.f32 512.0, %v291_v23 }
  0xac   : > { %1308 = vst [vmem:[%s2078_s17 + $0x490] sm:$0xff] %v1052_v27  ;;  %v548_v40 = vmul.f32 512.0, %v292_v24  ;;  %1309 = vst [vmem:[%s2078_s17 + $0x498] sm:$0xff] %v1053_v32  ;;  %v1057_v42 = vmul.f32 0.001953125, %v1677_v35  ;;  %v549_v43 = vmul.f32 512.0, %v293_v29  ;;  %v550_v44 = vmul.f32 512.0, %v294_v30 }
  0xad   : > { %1310 = vst [vmem:[%s2078_s17 + $0x4a0] sm:$0xff] %v1054_v33  ;;  %1311 = vst [vmem:[%s2078_s17 + $0x4a8] sm:$0xff] %v1055_v34  ;;  %v551_v45 = vmul.f32 512.0, %v295_v31  ;;  %v1678_v46 = vround.rtne.f32 %v546_v38  ;;  %v1679_v47 = vround.rtne.f32 %v547_v39  ;;  %v552_v49 = vmul.f32 512.0, %v296_v36  ;;  %v306_v22 = vld [vmem:[%s2055_s30 + $0x540] sm:$0xff]  ;;  %v307_v23 = vld [vmem:[%s2055_s30 + $0x548] sm:$0xff] }
  0xae   : > { %1312 = vst [vmem:[%s2078_s17 + $0x4b0] sm:$0xff] %v1056_v37  ;;  %v1680_v48 = vround.rtne.f32 %v548_v40  ;;  %1313 = vst [vmem:[%s2078_s17 + $0x4b8] sm:$0xff] %v1057_v42  ;;  %v1681_v50 = vround.rtne.f32 %v549_v43  ;;  %v1682_v51 = vround.rtne.f32 %v550_v44  ;;  %v553_v53 = vmul.f32 512.0, %v297_v41  ;;  %v308_v24 = vld [vmem:[%s2055_s30 + $0x550] sm:$0xff]  ;;  %v309_v29 = vld [vmem:[%s2055_s30 + $0x558] sm:$0xff] }
  0xaf   : > { %v1683_v52 = vround.rtne.f32 %v551_v45  ;;  %v1058_v57 = vmul.f32 0.001953125, %v1678_v46  ;;  %v1059_v58 = vmul.f32 0.001953125, %v1679_v47  ;;  %v1684_v60 = vround.rtne.f32 %v552_v49  ;;  %v310_v30 = vld [vmem:[%s2055_s30 + $0x560] sm:$0xff]  ;;  %v311_v31 = vld [vmem:[%s2055_s30 + $0x568] sm:$0xff]  ;;  %v312_v36 = vld [vmem:[%s2055_s30 + $0x570] sm:$0xff] }
  0xb0   : > { %v1060_v59 = vmul.f32 0.001953125, %v1680_v48  ;;  %v1061_v0 = vmul.f32 0.001953125, %v1681_v50  ;;  %v1062_v1 = vmul.f32 0.001953125, %v1682_v51  ;;  %v1685_v3 = vround.rtne.f32 %v553_v53  ;;  %v313_v41 = vld [vmem:[%s2055_s30 + $0x578] sm:$0xff] }
  0xb1   : > { %v1063_v2 = vmul.f32 0.001953125, %v1683_v52  ;;  %1314 = vst [vmem:[%s2078_s17 + $0x4c0] sm:$0xff] %v1058_v57  ;;  %1315 = vst [vmem:[%s2078_s17 + $0x4c8] sm:$0xff] %v1059_v58  ;;  %v1064_v5 = vmul.f32 0.001953125, %v1684_v60  ;;  %v554_v6 = vmul.f32 512.0, %v298_v54  ;;  %v555_v7 = vmul.f32 512.0, %v299_v55 }
  0xb2   : > { %1316 = vst [vmem:[%s2078_s17 + $0x4d0] sm:$0xff] %v1060_v59  ;;  %v556_v8 = vmul.f32 512.0, %v300_v56  ;;  %1317 = vst [vmem:[%s2078_s17 + $0x4d8] sm:$0xff] %v1061_v0  ;;  %v1065_v10 = vmul.f32 0.001953125, %v1685_v3  ;;  %v557_v11 = vmul.f32 512.0, %v301_v61  ;;  %v558_v12 = vmul.f32 512.0, %v302_v62 }
  0xb3   : > { %1318 = vst [vmem:[%s2078_s17 + $0x4e0] sm:$0xff] %v1062_v1  ;;  %1319 = vst [vmem:[%s2078_s17 + $0x4e8] sm:$0xff] %v1063_v2  ;;  %v559_v13 = vmul.f32 512.0, %v303_v63  ;;  %v1686_v14 = vround.rtne.f32 %v554_v6  ;;  %v1687_v15 = vround.rtne.f32 %v555_v7  ;;  %v560_v17 = vmul.f32 512.0, %v304_v4  ;;  %v314_v54 = vld [vmem:[%s2055_s30 + $0x580] sm:$0xff]  ;;  %v315_v55 = vld [vmem:[%s2055_s30 + $0x588] sm:$0xff] }
  0xb4   : > { %1320 = vst [vmem:[%s2078_s17 + $0x4f0] sm:$0xff] %v1064_v5  ;;  %v1688_v16 = vround.rtne.f32 %v556_v8  ;;  %1321 = vst [vmem:[%s2078_s17 + $0x4f8] sm:$0xff] %v1065_v10  ;;  %v1689_v18 = vround.rtne.f32 %v557_v11  ;;  %v1690_v19 = vround.rtne.f32 %v558_v12  ;;  %v561_v21 = vmul.f32 512.0, %v305_v9  ;;  %v316_v56 = vld [vmem:[%s2055_s30 + $0x590] sm:$0xff]  ;;  %v317_v61 = vld [vmem:[%s2055_s30 + $0x598] sm:$0xff] }
  0xb5   : > { %v1691_v20 = vround.rtne.f32 %v559_v13  ;;  %v1066_v25 = vmul.f32 0.001953125, %v1686_v14  ;;  %v1067_v26 = vmul.f32 0.001953125, %v1687_v15  ;;  %v1692_v28 = vround.rtne.f32 %v560_v17  ;;  %v318_v62 = vld [vmem:[%s2055_s30 + $0x5a0] sm:$0xff]  ;;  %v319_v63 = vld [vmem:[%s2055_s30 + $0x5a8] sm:$0xff]  ;;  %v320_v4 = vld [vmem:[%s2055_s30 + $0x5b0] sm:$0xff] }
  0xb6   : > { %v1068_v27 = vmul.f32 0.001953125, %v1688_v16  ;;  %v1069_v32 = vmul.f32 0.001953125, %v1689_v18  ;;  %v1070_v33 = vmul.f32 0.001953125, %v1690_v19  ;;  %v1693_v35 = vround.rtne.f32 %v561_v21  ;;  %v321_v9 = vld [vmem:[%s2055_s30 + $0x5b8] sm:$0xff] }
  0xb7   : > { %v1071_v34 = vmul.f32 0.001953125, %v1691_v20  ;;  %1322 = vst [vmem:[%s2078_s17 + $0x500] sm:$0xff] %v1066_v25  ;;  %1323 = vst [vmem:[%s2078_s17 + $0x508] sm:$0xff] %v1067_v26  ;;  %v1072_v37 = vmul.f32 0.001953125, %v1692_v28  ;;  %v562_v38 = vmul.f32 512.0, %v306_v22  ;;  %v563_v39 = vmul.f32 512.0, %v307_v23 }
  0xb8   : > { %1324 = vst [vmem:[%s2078_s17 + $0x510] sm:$0xff] %v1068_v27  ;;  %v564_v40 = vmul.f32 512.0, %v308_v24  ;;  %1325 = vst [vmem:[%s2078_s17 + $0x518] sm:$0xff] %v1069_v32  ;;  %v1073_v42 = vmul.f32 0.001953125, %v1693_v35  ;;  %v565_v43 = vmul.f32 512.0, %v309_v29  ;;  %v566_v44 = vmul.f32 512.0, %v310_v30 }
  0xb9   : > { %1326 = vst [vmem:[%s2078_s17 + $0x520] sm:$0xff] %v1070_v33  ;;  %1327 = vst [vmem:[%s2078_s17 + $0x528] sm:$0xff] %v1071_v34  ;;  %v567_v45 = vmul.f32 512.0, %v311_v31  ;;  %v1694_v46 = vround.rtne.f32 %v562_v38  ;;  %v1695_v47 = vround.rtne.f32 %v563_v39  ;;  %v568_v49 = vmul.f32 512.0, %v312_v36  ;;  %v322_v22 = vld [vmem:[%s2055_s30 + $0x5c0] sm:$0xff]  ;;  %v323_v23 = vld [vmem:[%s2055_s30 + $0x5c8] sm:$0xff] }
  0xba   : > { %1328 = vst [vmem:[%s2078_s17 + $0x530] sm:$0xff] %v1072_v37  ;;  %v1696_v48 = vround.rtne.f32 %v564_v40  ;;  %1329 = vst [vmem:[%s2078_s17 + $0x538] sm:$0xff] %v1073_v42  ;;  %v1697_v50 = vround.rtne.f32 %v565_v43  ;;  %v1698_v51 = vround.rtne.f32 %v566_v44  ;;  %v569_v53 = vmul.f32 512.0, %v313_v41  ;;  %v324_v24 = vld [vmem:[%s2055_s30 + $0x5d0] sm:$0xff]  ;;  %v325_v29 = vld [vmem:[%s2055_s30 + $0x5d8] sm:$0xff] }
  0xbb   : > { %v1699_v52 = vround.rtne.f32 %v567_v45  ;;  %v1074_v57 = vmul.f32 0.001953125, %v1694_v46  ;;  %v1075_v58 = vmul.f32 0.001953125, %v1695_v47  ;;  %v1700_v60 = vround.rtne.f32 %v568_v49  ;;  %v326_v30 = vld [vmem:[%s2055_s30 + $0x5e0] sm:$0xff]  ;;  %v327_v31 = vld [vmem:[%s2055_s30 + $0x5e8] sm:$0xff]  ;;  %v328_v36 = vld [vmem:[%s2055_s30 + $0x5f0] sm:$0xff] }
  0xbc   : > { %v1076_v59 = vmul.f32 0.001953125, %v1696_v48  ;;  %v1077_v0 = vmul.f32 0.001953125, %v1697_v50  ;;  %v1078_v1 = vmul.f32 0.001953125, %v1698_v51  ;;  %v1701_v3 = vround.rtne.f32 %v569_v53  ;;  %v329_v41 = vld [vmem:[%s2055_s30 + $0x5f8] sm:$0xff] }
  0xbd   : > { %v1079_v2 = vmul.f32 0.001953125, %v1699_v52  ;;  %1330 = vst [vmem:[%s2078_s17 + $0x540] sm:$0xff] %v1074_v57  ;;  %1331 = vst [vmem:[%s2078_s17 + $0x548] sm:$0xff] %v1075_v58  ;;  %v1080_v5 = vmul.f32 0.001953125, %v1700_v60  ;;  %v570_v6 = vmul.f32 512.0, %v314_v54  ;;  %v571_v7 = vmul.f32 512.0, %v315_v55 }
  0xbe   : > { %1332 = vst [vmem:[%s2078_s17 + $0x550] sm:$0xff] %v1076_v59  ;;  %v572_v8 = vmul.f32 512.0, %v316_v56  ;;  %1333 = vst [vmem:[%s2078_s17 + $0x558] sm:$0xff] %v1077_v0  ;;  %v1081_v10 = vmul.f32 0.001953125, %v1701_v3  ;;  %v573_v11 = vmul.f32 512.0, %v317_v61  ;;  %v574_v12 = vmul.f32 512.0, %v318_v62 }
  0xbf   : > { %1334 = vst [vmem:[%s2078_s17 + $0x560] sm:$0xff] %v1078_v1  ;;  %1335 = vst [vmem:[%s2078_s17 + $0x568] sm:$0xff] %v1079_v2  ;;  %v575_v13 = vmul.f32 512.0, %v319_v63  ;;  %v1702_v14 = vround.rtne.f32 %v570_v6  ;;  %v1703_v15 = vround.rtne.f32 %v571_v7  ;;  %v576_v17 = vmul.f32 512.0, %v320_v4  ;;  %v330_v54 = vld [vmem:[%s2055_s30 + $0x600] sm:$0xff]  ;;  %v331_v55 = vld [vmem:[%s2055_s30 + $0x608] sm:$0xff] }
  0xc0   : > { %1336 = vst [vmem:[%s2078_s17 + $0x570] sm:$0xff] %v1080_v5  ;;  %v1704_v16 = vround.rtne.f32 %v572_v8  ;;  %1337 = vst [vmem:[%s2078_s17 + $0x578] sm:$0xff] %v1081_v10  ;;  %v1705_v18 = vround.rtne.f32 %v573_v11  ;;  %v1706_v19 = vround.rtne.f32 %v574_v12  ;;  %v577_v21 = vmul.f32 512.0, %v321_v9  ;;  %v332_v56 = vld [vmem:[%s2055_s30 + $0x610] sm:$0xff]  ;;  %v333_v61 = vld [vmem:[%s2055_s30 + $0x618] sm:$0xff] }
  0xc1   : > { %v1707_v20 = vround.rtne.f32 %v575_v13  ;;  %v1082_v25 = vmul.f32 0.001953125, %v1702_v14  ;;  %v1083_v26 = vmul.f32 0.001953125, %v1703_v15  ;;  %v1708_v28 = vround.rtne.f32 %v576_v17  ;;  %v334_v62 = vld [vmem:[%s2055_s30 + $0x620] sm:$0xff]  ;;  %v335_v63 = vld [vmem:[%s2055_s30 + $0x628] sm:$0xff]  ;;  %v336_v4 = vld [vmem:[%s2055_s30 + $0x630] sm:$0xff] }
  0xc2   : > { %v1084_v27 = vmul.f32 0.001953125, %v1704_v16  ;;  %v1085_v32 = vmul.f32 0.001953125, %v1705_v18  ;;  %v1086_v33 = vmul.f32 0.001953125, %v1706_v19  ;;  %v1709_v35 = vround.rtne.f32 %v577_v21  ;;  %v337_v9 = vld [vmem:[%s2055_s30 + $0x638] sm:$0xff] }
  0xc3   : > { %v1087_v34 = vmul.f32 0.001953125, %v1707_v20  ;;  %1338 = vst [vmem:[%s2078_s17 + $0x580] sm:$0xff] %v1082_v25  ;;  %1339 = vst [vmem:[%s2078_s17 + $0x588] sm:$0xff] %v1083_v26  ;;  %v1088_v37 = vmul.f32 0.001953125, %v1708_v28  ;;  %v578_v38 = vmul.f32 512.0, %v322_v22  ;;  %v579_v39 = vmul.f32 512.0, %v323_v23 }
  0xc4   : > { %1340 = vst [vmem:[%s2078_s17 + $0x590] sm:$0xff] %v1084_v27  ;;  %v580_v40 = vmul.f32 512.0, %v324_v24  ;;  %1341 = vst [vmem:[%s2078_s17 + $0x598] sm:$0xff] %v1085_v32  ;;  %v1089_v42 = vmul.f32 0.001953125, %v1709_v35  ;;  %v581_v43 = vmul.f32 512.0, %v325_v29  ;;  %v582_v44 = vmul.f32 512.0, %v326_v30 }
  0xc5   : > { %1342 = vst [vmem:[%s2078_s17 + $0x5a0] sm:$0xff] %v1086_v33  ;;  %1343 = vst [vmem:[%s2078_s17 + $0x5a8] sm:$0xff] %v1087_v34  ;;  %v583_v45 = vmul.f32 512.0, %v327_v31  ;;  %v1710_v46 = vround.rtne.f32 %v578_v38  ;;  %v1711_v47 = vround.rtne.f32 %v579_v39  ;;  %v584_v49 = vmul.f32 512.0, %v328_v36  ;;  %v338_v22 = vld [vmem:[%s2055_s30 + $0x640] sm:$0xff]  ;;  %v339_v23 = vld [vmem:[%s2055_s30 + $0x648] sm:$0xff] }
  0xc6   : > { %1344 = vst [vmem:[%s2078_s17 + $0x5b0] sm:$0xff] %v1088_v37  ;;  %v1712_v48 = vround.rtne.f32 %v580_v40  ;;  %1345 = vst [vmem:[%s2078_s17 + $0x5b8] sm:$0xff] %v1089_v42  ;;  %v1713_v50 = vround.rtne.f32 %v581_v43  ;;  %v1714_v51 = vround.rtne.f32 %v582_v44  ;;  %v585_v53 = vmul.f32 512.0, %v329_v41  ;;  %v340_v24 = vld [vmem:[%s2055_s30 + $0x650] sm:$0xff]  ;;  %v341_v29 = vld [vmem:[%s2055_s30 + $0x658] sm:$0xff] }
  0xc7   : > { %v1715_v52 = vround.rtne.f32 %v583_v45  ;;  %v1090_v57 = vmul.f32 0.001953125, %v1710_v46  ;;  %v1091_v58 = vmul.f32 0.001953125, %v1711_v47  ;;  %v1716_v60 = vround.rtne.f32 %v584_v49  ;;  %v342_v30 = vld [vmem:[%s2055_s30 + $0x660] sm:$0xff]  ;;  %v343_v31 = vld [vmem:[%s2055_s30 + $0x668] sm:$0xff]  ;;  %v344_v36 = vld [vmem:[%s2055_s30 + $0x670] sm:$0xff] }
  0xc8   : > { %v1092_v59 = vmul.f32 0.001953125, %v1712_v48  ;;  %v1093_v0 = vmul.f32 0.001953125, %v1713_v50  ;;  %v1094_v1 = vmul.f32 0.001953125, %v1714_v51  ;;  %v1717_v3 = vround.rtne.f32 %v585_v53  ;;  %v345_v41 = vld [vmem:[%s2055_s30 + $0x678] sm:$0xff] }
  0xc9   : > { %v1095_v2 = vmul.f32 0.001953125, %v1715_v52  ;;  %1346 = vst [vmem:[%s2078_s17 + $0x5c0] sm:$0xff] %v1090_v57  ;;  %1347 = vst [vmem:[%s2078_s17 + $0x5c8] sm:$0xff] %v1091_v58  ;;  %v1096_v5 = vmul.f32 0.001953125, %v1716_v60  ;;  %v586_v6 = vmul.f32 512.0, %v330_v54  ;;  %v587_v7 = vmul.f32 512.0, %v331_v55 }
  0xca   : > { %1348 = vst [vmem:[%s2078_s17 + $0x5d0] sm:$0xff] %v1092_v59  ;;  %v588_v8 = vmul.f32 512.0, %v332_v56  ;;  %1349 = vst [vmem:[%s2078_s17 + $0x5d8] sm:$0xff] %v1093_v0  ;;  %v1097_v10 = vmul.f32 0.001953125, %v1717_v3  ;;  %v589_v11 = vmul.f32 512.0, %v333_v61  ;;  %v590_v12 = vmul.f32 512.0, %v334_v62 }
  0xcb   : > { %1350 = vst [vmem:[%s2078_s17 + $0x5e0] sm:$0xff] %v1094_v1  ;;  %1351 = vst [vmem:[%s2078_s17 + $0x5e8] sm:$0xff] %v1095_v2  ;;  %v591_v13 = vmul.f32 512.0, %v335_v63  ;;  %v1718_v14 = vround.rtne.f32 %v586_v6  ;;  %v1719_v15 = vround.rtne.f32 %v587_v7  ;;  %v592_v17 = vmul.f32 512.0, %v336_v4  ;;  %v346_v54 = vld [vmem:[%s2055_s30 + $0x680] sm:$0xff]  ;;  %v347_v55 = vld [vmem:[%s2055_s30 + $0x688] sm:$0xff] }
  0xcc   : > { %1352 = vst [vmem:[%s2078_s17 + $0x5f0] sm:$0xff] %v1096_v5  ;;  %v1720_v16 = vround.rtne.f32 %v588_v8  ;;  %1353 = vst [vmem:[%s2078_s17 + $0x5f8] sm:$0xff] %v1097_v10  ;;  %v1721_v18 = vround.rtne.f32 %v589_v11  ;;  %v1722_v19 = vround.rtne.f32 %v590_v12  ;;  %v593_v21 = vmul.f32 512.0, %v337_v9  ;;  %v348_v56 = vld [vmem:[%s2055_s30 + $0x690] sm:$0xff]  ;;  %v349_v61 = vld [vmem:[%s2055_s30 + $0x698] sm:$0xff] }
  0xcd   : > { %v1723_v20 = vround.rtne.f32 %v591_v13  ;;  %v1098_v25 = vmul.f32 0.001953125, %v1718_v14  ;;  %v1099_v26 = vmul.f32 0.001953125, %v1719_v15  ;;  %v1724_v28 = vround.rtne.f32 %v592_v17  ;;  %v350_v62 = vld [vmem:[%s2055_s30 + $0x6a0] sm:$0xff]  ;;  %v351_v63 = vld [vmem:[%s2055_s30 + $0x6a8] sm:$0xff]  ;;  %v352_v4 = vld [vmem:[%s2055_s30 + $0x6b0] sm:$0xff] }
  0xce   : > { %v1100_v27 = vmul.f32 0.001953125, %v1720_v16  ;;  %v1101_v32 = vmul.f32 0.001953125, %v1721_v18  ;;  %v1102_v33 = vmul.f32 0.001953125, %v1722_v19  ;;  %v1725_v35 = vround.rtne.f32 %v593_v21  ;;  %v353_v9 = vld [vmem:[%s2055_s30 + $0x6b8] sm:$0xff] }
  0xcf   : > { %v1103_v34 = vmul.f32 0.001953125, %v1723_v20  ;;  %1354 = vst [vmem:[%s2078_s17 + $0x600] sm:$0xff] %v1098_v25  ;;  %1355 = vst [vmem:[%s2078_s17 + $0x608] sm:$0xff] %v1099_v26  ;;  %v1104_v37 = vmul.f32 0.001953125, %v1724_v28  ;;  %v594_v38 = vmul.f32 512.0, %v338_v22  ;;  %v595_v39 = vmul.f32 512.0, %v339_v23 }
  0xd0   : > { %1356 = vst [vmem:[%s2078_s17 + $0x610] sm:$0xff] %v1100_v27  ;;  %v596_v40 = vmul.f32 512.0, %v340_v24  ;;  %1357 = vst [vmem:[%s2078_s17 + $0x618] sm:$0xff] %v1101_v32  ;;  %v1105_v42 = vmul.f32 0.001953125, %v1725_v35  ;;  %v597_v43 = vmul.f32 512.0, %v341_v29  ;;  %v598_v44 = vmul.f32 512.0, %v342_v30 }
  0xd1   : > { %1358 = vst [vmem:[%s2078_s17 + $0x620] sm:$0xff] %v1102_v33  ;;  %1359 = vst [vmem:[%s2078_s17 + $0x628] sm:$0xff] %v1103_v34  ;;  %v599_v45 = vmul.f32 512.0, %v343_v31  ;;  %v1726_v46 = vround.rtne.f32 %v594_v38  ;;  %v1727_v47 = vround.rtne.f32 %v595_v39  ;;  %v600_v49 = vmul.f32 512.0, %v344_v36  ;;  %v354_v22 = vld [vmem:[%s2055_s30 + $0x6c0] sm:$0xff]  ;;  %v355_v23 = vld [vmem:[%s2055_s30 + $0x6c8] sm:$0xff] }
  0xd2   : > { %1360 = vst [vmem:[%s2078_s17 + $0x630] sm:$0xff] %v1104_v37  ;;  %v1728_v48 = vround.rtne.f32 %v596_v40  ;;  %1361 = vst [vmem:[%s2078_s17 + $0x638] sm:$0xff] %v1105_v42  ;;  %v1729_v50 = vround.rtne.f32 %v597_v43  ;;  %v1730_v51 = vround.rtne.f32 %v598_v44  ;;  %v601_v53 = vmul.f32 512.0, %v345_v41  ;;  %v356_v24 = vld [vmem:[%s2055_s30 + $0x6d0] sm:$0xff]  ;;  %v357_v29 = vld [vmem:[%s2055_s30 + $0x6d8] sm:$0xff] }
  0xd3   : > { %v1731_v52 = vround.rtne.f32 %v599_v45  ;;  %v1106_v57 = vmul.f32 0.001953125, %v1726_v46  ;;  %v1107_v58 = vmul.f32 0.001953125, %v1727_v47  ;;  %v1732_v60 = vround.rtne.f32 %v600_v49  ;;  %v358_v30 = vld [vmem:[%s2055_s30 + $0x6e0] sm:$0xff]  ;;  %v359_v31 = vld [vmem:[%s2055_s30 + $0x6e8] sm:$0xff]  ;;  %v360_v36 = vld [vmem:[%s2055_s30 + $0x6f0] sm:$0xff] }
  0xd4   : > { %v1108_v59 = vmul.f32 0.001953125, %v1728_v48  ;;  %v1109_v0 = vmul.f32 0.001953125, %v1729_v50  ;;  %v1110_v1 = vmul.f32 0.001953125, %v1730_v51  ;;  %v1733_v3 = vround.rtne.f32 %v601_v53  ;;  %v361_v41 = vld [vmem:[%s2055_s30 + $0x6f8] sm:$0xff] }
  0xd5   : > { %v1111_v2 = vmul.f32 0.001953125, %v1731_v52  ;;  %1362 = vst [vmem:[%s2078_s17 + $0x640] sm:$0xff] %v1106_v57  ;;  %1363 = vst [vmem:[%s2078_s17 + $0x648] sm:$0xff] %v1107_v58  ;;  %v1112_v5 = vmul.f32 0.001953125, %v1732_v60  ;;  %v602_v6 = vmul.f32 512.0, %v346_v54  ;;  %v603_v7 = vmul.f32 512.0, %v347_v55 }
  0xd6   : > { %1364 = vst [vmem:[%s2078_s17 + $0x650] sm:$0xff] %v1108_v59  ;;  %v604_v8 = vmul.f32 512.0, %v348_v56  ;;  %1365 = vst [vmem:[%s2078_s17 + $0x658] sm:$0xff] %v1109_v0  ;;  %v1113_v10 = vmul.f32 0.001953125, %v1733_v3  ;;  %v605_v11 = vmul.f32 512.0, %v349_v61  ;;  %v606_v12 = vmul.f32 512.0, %v350_v62 }
  0xd7   : > { %1366 = vst [vmem:[%s2078_s17 + $0x660] sm:$0xff] %v1110_v1  ;;  %1367 = vst [vmem:[%s2078_s17 + $0x668] sm:$0xff] %v1111_v2  ;;  %v607_v13 = vmul.f32 512.0, %v351_v63  ;;  %v1734_v14 = vround.rtne.f32 %v602_v6  ;;  %v1735_v15 = vround.rtne.f32 %v603_v7  ;;  %v608_v17 = vmul.f32 512.0, %v352_v4  ;;  %v362_v54 = vld [vmem:[%s2055_s30 + $0x700] sm:$0xff]  ;;  %v363_v55 = vld [vmem:[%s2055_s30 + $0x708] sm:$0xff] }
  0xd8   : > { %1368 = vst [vmem:[%s2078_s17 + $0x670] sm:$0xff] %v1112_v5  ;;  %v1736_v16 = vround.rtne.f32 %v604_v8  ;;  %1369 = vst [vmem:[%s2078_s17 + $0x678] sm:$0xff] %v1113_v10  ;;  %v1737_v18 = vround.rtne.f32 %v605_v11  ;;  %v1738_v19 = vround.rtne.f32 %v606_v12  ;;  %v609_v21 = vmul.f32 512.0, %v353_v9  ;;  %v364_v56 = vld [vmem:[%s2055_s30 + $0x710] sm:$0xff]  ;;  %v365_v61 = vld [vmem:[%s2055_s30 + $0x718] sm:$0xff] }
  0xd9   : > { %v1739_v20 = vround.rtne.f32 %v607_v13  ;;  %v1114_v25 = vmul.f32 0.001953125, %v1734_v14  ;;  %v1115_v26 = vmul.f32 0.001953125, %v1735_v15  ;;  %v1740_v28 = vround.rtne.f32 %v608_v17  ;;  %v366_v62 = vld [vmem:[%s2055_s30 + $0x720] sm:$0xff]  ;;  %v367_v63 = vld [vmem:[%s2055_s30 + $0x728] sm:$0xff]  ;;  %v368_v4 = vld [vmem:[%s2055_s30 + $0x730] sm:$0xff] }
  0xda   : > { %v1116_v27 = vmul.f32 0.001953125, %v1736_v16  ;;  %v1117_v32 = vmul.f32 0.001953125, %v1737_v18  ;;  %v1118_v33 = vmul.f32 0.001953125, %v1738_v19  ;;  %v1741_v35 = vround.rtne.f32 %v609_v21  ;;  %v369_v9 = vld [vmem:[%s2055_s30 + $0x738] sm:$0xff] }
  0xdb   : > { %v1119_v34 = vmul.f32 0.001953125, %v1739_v20  ;;  %1370 = vst [vmem:[%s2078_s17 + $0x680] sm:$0xff] %v1114_v25  ;;  %1371 = vst [vmem:[%s2078_s17 + $0x688] sm:$0xff] %v1115_v26  ;;  %v1120_v37 = vmul.f32 0.001953125, %v1740_v28  ;;  %v610_v38 = vmul.f32 512.0, %v354_v22  ;;  %v611_v39 = vmul.f32 512.0, %v355_v23 }
  0xdc   : > { %1372 = vst [vmem:[%s2078_s17 + $0x690] sm:$0xff] %v1116_v27  ;;  %v612_v40 = vmul.f32 512.0, %v356_v24  ;;  %1373 = vst [vmem:[%s2078_s17 + $0x698] sm:$0xff] %v1117_v32  ;;  %v1121_v42 = vmul.f32 0.001953125, %v1741_v35  ;;  %v613_v43 = vmul.f32 512.0, %v357_v29  ;;  %v614_v44 = vmul.f32 512.0, %v358_v30 }
  0xdd   : > { %1374 = vst [vmem:[%s2078_s17 + $0x6a0] sm:$0xff] %v1118_v33  ;;  %1375 = vst [vmem:[%s2078_s17 + $0x6a8] sm:$0xff] %v1119_v34  ;;  %v615_v45 = vmul.f32 512.0, %v359_v31  ;;  %v1742_v46 = vround.rtne.f32 %v610_v38  ;;  %v1743_v47 = vround.rtne.f32 %v611_v39  ;;  %v616_v49 = vmul.f32 512.0, %v360_v36  ;;  %v370_v22 = vld [vmem:[%s2055_s30 + $0x740] sm:$0xff]  ;;  %v371_v23 = vld [vmem:[%s2055_s30 + $0x748] sm:$0xff] }
  0xde   : > { %1376 = vst [vmem:[%s2078_s17 + $0x6b0] sm:$0xff] %v1120_v37  ;;  %v1744_v48 = vround.rtne.f32 %v612_v40  ;;  %1377 = vst [vmem:[%s2078_s17 + $0x6b8] sm:$0xff] %v1121_v42  ;;  %v1745_v50 = vround.rtne.f32 %v613_v43  ;;  %v1746_v51 = vround.rtne.f32 %v614_v44  ;;  %v617_v53 = vmul.f32 512.0, %v361_v41  ;;  %v372_v24 = vld [vmem:[%s2055_s30 + $0x750] sm:$0xff]  ;;  %v373_v29 = vld [vmem:[%s2055_s30 + $0x758] sm:$0xff] }
  0xdf   : > { %v1747_v52 = vround.rtne.f32 %v615_v45  ;;  %v1122_v57 = vmul.f32 0.001953125, %v1742_v46  ;;  %v1123_v58 = vmul.f32 0.001953125, %v1743_v47  ;;  %v1748_v60 = vround.rtne.f32 %v616_v49  ;;  %v374_v30 = vld [vmem:[%s2055_s30 + $0x760] sm:$0xff]  ;;  %v375_v31 = vld [vmem:[%s2055_s30 + $0x768] sm:$0xff]  ;;  %v376_v36 = vld [vmem:[%s2055_s30 + $0x770] sm:$0xff] }
  0xe0   : > { %v1124_v59 = vmul.f32 0.001953125, %v1744_v48  ;;  %v1125_v0 = vmul.f32 0.001953125, %v1745_v50  ;;  %v1126_v1 = vmul.f32 0.001953125, %v1746_v51  ;;  %v1749_v3 = vround.rtne.f32 %v617_v53  ;;  %v377_v41 = vld [vmem:[%s2055_s30 + $0x778] sm:$0xff] }
  0xe1   : > { %v1127_v2 = vmul.f32 0.001953125, %v1747_v52  ;;  %1378 = vst [vmem:[%s2078_s17 + $0x6c0] sm:$0xff] %v1122_v57  ;;  %1379 = vst [vmem:[%s2078_s17 + $0x6c8] sm:$0xff] %v1123_v58  ;;  %v1128_v5 = vmul.f32 0.001953125, %v1748_v60  ;;  %v618_v6 = vmul.f32 512.0, %v362_v54  ;;  %v619_v7 = vmul.f32 512.0, %v363_v55 }
  0xe2   : > { %1380 = vst [vmem:[%s2078_s17 + $0x6d0] sm:$0xff] %v1124_v59  ;;  %v620_v8 = vmul.f32 512.0, %v364_v56  ;;  %1381 = vst [vmem:[%s2078_s17 + $0x6d8] sm:$0xff] %v1125_v0  ;;  %v1129_v10 = vmul.f32 0.001953125, %v1749_v3  ;;  %v621_v11 = vmul.f32 512.0, %v365_v61  ;;  %v622_v12 = vmul.f32 512.0, %v366_v62 }
  0xe3   : > { %1382 = vst [vmem:[%s2078_s17 + $0x6e0] sm:$0xff] %v1126_v1  ;;  %1383 = vst [vmem:[%s2078_s17 + $0x6e8] sm:$0xff] %v1127_v2  ;;  %v623_v13 = vmul.f32 512.0, %v367_v63  ;;  %v1750_v14 = vround.rtne.f32 %v618_v6  ;;  %v1751_v15 = vround.rtne.f32 %v619_v7  ;;  %v624_v17 = vmul.f32 512.0, %v368_v4  ;;  %v378_v54 = vld [vmem:[%s2055_s30 + $0x780] sm:$0xff]  ;;  %v379_v55 = vld [vmem:[%s2055_s30 + $0x788] sm:$0xff] }
  0xe4   : > { %1384 = vst [vmem:[%s2078_s17 + $0x6f0] sm:$0xff] %v1128_v5  ;;  %v1752_v16 = vround.rtne.f32 %v620_v8  ;;  %1385 = vst [vmem:[%s2078_s17 + $0x6f8] sm:$0xff] %v1129_v10  ;;  %v1753_v18 = vround.rtne.f32 %v621_v11  ;;  %v1754_v19 = vround.rtne.f32 %v622_v12  ;;  %v625_v21 = vmul.f32 512.0, %v369_v9  ;;  %v380_v56 = vld [vmem:[%s2055_s30 + $0x790] sm:$0xff]  ;;  %v381_v61 = vld [vmem:[%s2055_s30 + $0x798] sm:$0xff] }
  0xe5   : > { %v1755_v20 = vround.rtne.f32 %v623_v13  ;;  %v1130_v25 = vmul.f32 0.001953125, %v1750_v14  ;;  %v1131_v26 = vmul.f32 0.001953125, %v1751_v15  ;;  %v1756_v28 = vround.rtne.f32 %v624_v17  ;;  %v382_v62 = vld [vmem:[%s2055_s30 + $0x7a0] sm:$0xff]  ;;  %v383_v63 = vld [vmem:[%s2055_s30 + $0x7a8] sm:$0xff]  ;;  %v384_v4 = vld [vmem:[%s2055_s30 + $0x7b0] sm:$0xff] }
  0xe6   : > { %v1132_v27 = vmul.f32 0.001953125, %v1752_v16  ;;  %v1133_v32 = vmul.f32 0.001953125, %v1753_v18  ;;  %v1134_v33 = vmul.f32 0.001953125, %v1754_v19  ;;  %v1757_v35 = vround.rtne.f32 %v625_v21  ;;  %v385_v9 = vld [vmem:[%s2055_s30 + $0x7b8] sm:$0xff] }
  0xe7   : > { %v1135_v34 = vmul.f32 0.001953125, %v1755_v20  ;;  %1386 = vst [vmem:[%s2078_s17 + $0x700] sm:$0xff] %v1130_v25  ;;  %1387 = vst [vmem:[%s2078_s17 + $0x708] sm:$0xff] %v1131_v26  ;;  %v1136_v37 = vmul.f32 0.001953125, %v1756_v28  ;;  %v626_v38 = vmul.f32 512.0, %v370_v22  ;;  %v627_v39 = vmul.f32 512.0, %v371_v23 }
  0xe8   : > { %1388 = vst [vmem:[%s2078_s17 + $0x710] sm:$0xff] %v1132_v27  ;;  %v628_v40 = vmul.f32 512.0, %v372_v24  ;;  %1389 = vst [vmem:[%s2078_s17 + $0x718] sm:$0xff] %v1133_v32  ;;  %v1137_v42 = vmul.f32 0.001953125, %v1757_v35  ;;  %v629_v43 = vmul.f32 512.0, %v373_v29  ;;  %v630_v44 = vmul.f32 512.0, %v374_v30 }
  0xe9   : > { %1390 = vst [vmem:[%s2078_s17 + $0x720] sm:$0xff] %v1134_v33  ;;  %1391 = vst [vmem:[%s2078_s17 + $0x728] sm:$0xff] %v1135_v34  ;;  %v631_v45 = vmul.f32 512.0, %v375_v31  ;;  %v1758_v46 = vround.rtne.f32 %v626_v38  ;;  %v1759_v47 = vround.rtne.f32 %v627_v39  ;;  %v632_v49 = vmul.f32 512.0, %v376_v36  ;;  %v386_v22 = vld [vmem:[%s2055_s30 + $0x7c0] sm:$0xff]  ;;  %v387_v23 = vld [vmem:[%s2055_s30 + $0x7c8] sm:$0xff] }
  0xea   : > { %1392 = vst [vmem:[%s2078_s17 + $0x730] sm:$0xff] %v1136_v37  ;;  %v1760_v48 = vround.rtne.f32 %v628_v40  ;;  %1393 = vst [vmem:[%s2078_s17 + $0x738] sm:$0xff] %v1137_v42  ;;  %v1761_v50 = vround.rtne.f32 %v629_v43  ;;  %v1762_v51 = vround.rtne.f32 %v630_v44  ;;  %v633_v53 = vmul.f32 512.0, %v377_v41  ;;  %v388_v24 = vld [vmem:[%s2055_s30 + $0x7d0] sm:$0xff]  ;;  %v389_v29 = vld [vmem:[%s2055_s30 + $0x7d8] sm:$0xff] }
  0xeb   : > { %v1763_v52 = vround.rtne.f32 %v631_v45  ;;  %v1138_v57 = vmul.f32 0.001953125, %v1758_v46  ;;  %v1139_v58 = vmul.f32 0.001953125, %v1759_v47  ;;  %v1764_v60 = vround.rtne.f32 %v632_v49  ;;  %v390_v30 = vld [vmem:[%s2055_s30 + $0x7e0] sm:$0xff]  ;;  %v391_v31 = vld [vmem:[%s2055_s30 + $0x7e8] sm:$0xff]  ;;  %v392_v36 = vld [vmem:[%s2055_s30 + $0x7f0] sm:$0xff] }
  0xec   : > { %v1140_v59 = vmul.f32 0.001953125, %v1760_v48  ;;  %v1141_v0 = vmul.f32 0.001953125, %v1761_v50  ;;  %v1142_v1 = vmul.f32 0.001953125, %v1762_v51  ;;  %v1765_v3 = vround.rtne.f32 %v633_v53  ;;  %v393_v41 = vld [vmem:[%s2055_s30 + $0x7f8] sm:$0xff] }
  0xed   : > { %v1143_v2 = vmul.f32 0.001953125, %v1763_v52  ;;  %1394 = vst [vmem:[%s2078_s17 + $0x740] sm:$0xff] %v1138_v57  ;;  %1395 = vst [vmem:[%s2078_s17 + $0x748] sm:$0xff] %v1139_v58  ;;  %v1144_v5 = vmul.f32 0.001953125, %v1764_v60  ;;  %v634_v6 = vmul.f32 512.0, %v378_v54  ;;  %v635_v7 = vmul.f32 512.0, %v379_v55 }
  0xee   : > { %1396 = vst [vmem:[%s2078_s17 + $0x750] sm:$0xff] %v1140_v59  ;;  %v636_v8 = vmul.f32 512.0, %v380_v56  ;;  %1397 = vst [vmem:[%s2078_s17 + $0x758] sm:$0xff] %v1141_v0  ;;  %v1145_v10 = vmul.f32 0.001953125, %v1765_v3  ;;  %v637_v11 = vmul.f32 512.0, %v381_v61  ;;  %v638_v12 = vmul.f32 512.0, %v382_v62 }
  0xef   : > { %1398 = vst [vmem:[%s2078_s17 + $0x760] sm:$0xff] %v1142_v1  ;;  %1399 = vst [vmem:[%s2078_s17 + $0x768] sm:$0xff] %v1143_v2  ;;  %v639_v13 = vmul.f32 512.0, %v383_v63  ;;  %v1766_v14 = vround.rtne.f32 %v634_v6  ;;  %v1767_v15 = vround.rtne.f32 %v635_v7  ;;  %v640_v17 = vmul.f32 512.0, %v384_v4 }
  0xf0   : > { %1400 = vst [vmem:[%s2078_s17 + $0x770] sm:$0xff] %v1144_v5  ;;  %v1768_v16 = vround.rtne.f32 %v636_v8  ;;  %1401 = vst [vmem:[%s2078_s17 + $0x778] sm:$0xff] %v1145_v10  ;;  %v1769_v18 = vround.rtne.f32 %v637_v11  ;;  %v1770_v19 = vround.rtne.f32 %v638_v12  ;;  %v641_v21 = vmul.f32 512.0, %v385_v9 }
  0xf1   : > { %v1771_v20 = vround.rtne.f32 %v639_v13  ;;  %v1146_v25 = vmul.f32 0.001953125, %v1766_v14  ;;  %v1147_v26 = vmul.f32 0.001953125, %v1767_v15  ;;  %v1772_v28 = vround.rtne.f32 %v640_v17 }
  0xf2   : > { %v1148_v27 = vmul.f32 0.001953125, %v1768_v16  ;;  %v1149_v32 = vmul.f32 0.001953125, %v1769_v18  ;;  %v1150_v33 = vmul.f32 0.001953125, %v1770_v19  ;;  %v1773_v35 = vround.rtne.f32 %v641_v21 }
  0xf3   : > { %v1151_v34 = vmul.f32 0.001953125, %v1771_v20  ;;  %1402 = vst [vmem:[%s2078_s17 + $0x780] sm:$0xff] %v1146_v25  ;;  %1403 = vst [vmem:[%s2078_s17 + $0x788] sm:$0xff] %v1147_v26  ;;  %v1152_v37 = vmul.f32 0.001953125, %v1772_v28  ;;  %v642_v38 = vmul.f32 512.0, %v386_v22  ;;  %v643_v39 = vmul.f32 512.0, %v387_v23 }
  0xf4   : > { %1404 = vst [vmem:[%s2078_s17 + $0x790] sm:$0xff] %v1148_v27  ;;  %v644_v40 = vmul.f32 512.0, %v388_v24  ;;  %1405 = vst [vmem:[%s2078_s17 + $0x798] sm:$0xff] %v1149_v32  ;;  %v1153_v42 = vmul.f32 0.001953125, %v1773_v35  ;;  %v645_v43 = vmul.f32 512.0, %v389_v29  ;;  %v646_v44 = vmul.f32 512.0, %v390_v30 }
  0xf5   : > { %1406 = vst [vmem:[%s2078_s17 + $0x7a0] sm:$0xff] %v1150_v33  ;;  %1407 = vst [vmem:[%s2078_s17 + $0x7a8] sm:$0xff] %v1151_v34  ;;  %v647_v45 = vmul.f32 512.0, %v391_v31  ;;  %v1774_v46 = vround.rtne.f32 %v642_v38  ;;  %v1775_v47 = vround.rtne.f32 %v643_v39  ;;  %v648_v49 = vmul.f32 512.0, %v392_v36 }
  0xf6   : > { %1408 = vst [vmem:[%s2078_s17 + $0x7b0] sm:$0xff] %v1152_v37  ;;  %v1776_v48 = vround.rtne.f32 %v644_v40  ;;  %1409 = vst [vmem:[%s2078_s17 + $0x7b8] sm:$0xff] %v1153_v42  ;;  %v1777_v50 = vround.rtne.f32 %v645_v43  ;;  %v1778_v51 = vround.rtne.f32 %v646_v44  ;;  %v649_v53 = vmul.f32 512.0, %v393_v41 }
  0xf7   : > { %v1779_v52 = vround.rtne.f32 %v647_v45  ;;  %v1154_v54 = vmul.f32 0.001953125, %v1774_v46  ;;  %v1155_v55 = vmul.f32 0.001953125, %v1775_v47  ;;  %v1780_v57 = vround.rtne.f32 %v648_v49 }
  0xf8   : > { %v1156_v56 = vmul.f32 0.001953125, %v1776_v48  ;;  %v1157_v58 = vmul.f32 0.001953125, %v1777_v50  ;;  %v1158_v59 = vmul.f32 0.001953125, %v1778_v51  ;;  %v1781_v61 = vround.rtne.f32 %v649_v53 }
  0xf9   : > { %v1159_v60 = vmul.f32 0.001953125, %v1779_v52  ;;  %1410 = vst [vmem:[%s2078_s17 + $0x7c0] sm:$0xff] %v1154_v54  ;;  %1411 = vst [vmem:[%s2078_s17 + $0x7c8] sm:$0xff] %v1155_v55  ;;  %v1160_v62 = vmul.f32 0.001953125, %v1780_v57 }
  0xfa   : > { %1412 = vst [vmem:[%s2078_s17 + $0x7d0] sm:$0xff] %v1156_v56  ;;  %1413 = vst [vmem:[%s2078_s17 + $0x7d8] sm:$0xff] %v1157_v58  ;;  %v1161_v63 = vmul.f32 0.001953125, %v1781_v61 }
  0xfb   : > { %1414 = vst [vmem:[%s2078_s17 + $0x7e0] sm:$0xff] %v1158_v59  ;;  %1415 = vst [vmem:[%s2078_s17 + $0x7e8] sm:$0xff] %v1159_v60 }
  0xfc   : > { %1416 = vst [vmem:[%s2078_s17 + $0x7f0] sm:$0xff] %v1160_v62  ;;  %1417 = vst [vmem:[%s2078_s17 + $0x7f8] sm:$0xff] %v1161_v63 }
  0xfd   : > { %1875 = shalt.err (!%p1872_p1)
}
  0xfe   : > { %s1876_s13 = scalar_lea.hbm %s2577_s29, 32768  ;;  %s1880_s20 = scalar_lea.hbm %s2628_s1, 131072 }
  0xff   : > { %p1877_p3 = scmp.ne.s32.totalorder %s2577_s29, %s1876_s13  ;;  %p1881_p0 = scmp.lt.u32.totalorder %s2577_s29, %s2628_s1 }
 0x100   : > { %p1882_p2 = scmp.lt.u32.totalorder %s1880_s20, %s1876_s13  ;;  %p1884_p6 = scmp.lt.u32.totalorder %s1876_s13, %s2577_s29 }
 0x101   : > { %p1878_p4 = pnand %p1877_p3, %p2635_p10 }
 0x102   : > { %p1883_p7 = por %p1882_p2, %p1881_p0 }
 0x103   : > { %p1879_p5 = pneg %p1878_p4 }
 0x104   : > { %p1885_p11 = por %p1884_p6, %p1883_p7 }
 0x106   : > { %p1886_p12 = pnand %p1885_p11, %p1879_p5 }
 0x108   : > { %1889 = shalt.err (!%p1886_p12)
}
 0x109   : > { %s1934_s24 = smov 1024   ;;  %s1935_s26 = smov 64  }
 0x10a   : > { %1784 = dma.vmem_to_hbm [thread:$0]  (%p2635_p10), %s2579_s27, 32768, %s2577_s29, %s1419_s2, %s1934_s24, %s1934_s24, %s1935_s26  }
 0x10b PF: > { %p1795_p8 = scmp.ge.s32.totalorder %s1928_s9, 2  ;;  %s1448_s30 = sand.u32 1, %s1916_s6  }
 0x10c   : > { %p2636_p9 = scmp.ne.s32.totalorder %s2633_s19, 0  ;;  %s1449_s17 = scalar_lea.sflag [#allocation4], %s1448_s30 }
 0x10e   : > { %p1791_p13 = pnand %p1795_p8, %p2636_p9 }
 0x110   : > { %1911 = dma.done.wait (!%p1791_p13), %s1449_s17, 32768  }
 0x111   : > { %1913 = vsyncadd (!%p1791_p13), %s1449_s17, 4294934528  ;;  %p14_p1 = scmp.ge.s32.totalorder %s1971_s12, 6   ;;  %s2637_s6 = smov %s1920_s7 }
 0x112   : > { %s2638_s7 = smov %s1924_s8  ;;  %s2639_s8 = smov %s1983_s15 }
 0x113   : > { %s2640_s9 = smov %s1971_s12  ;;  %16 = sbr.rel (!%p14_p1) target bundleno = 5 (0x5), region = 69 }
 0x11a   :  { %1454 = vsyncpa [#allocation3], 1 }
 0x11b   :  { %1456 = vsyncpa [#allocation3 + $0x1], 1 }
 0x11c   :  { %1457 = vsyncpa [#allocation4], 1 }
 0x11d   :  { %1459 = vsyncpa [#allocation4 + $0x1], 1 }

</bundles_post_ra>
